<compile_context>
chip_gen: v6e
topology: v6e:2x2x1
jax: 0.10.0
libtpu: 0.0.40
codegen_flags: <defaults>
</compile_context>

<pallas_src>
import functools

import jax
import jax.numpy as jnp
from jax import lax
from jax.experimental import pallas as pl
from jax.experimental.pallas import tpu as pltpu

N_BINS = 15
LANES = 128        # lane width; the packed histogram lives in one 128-lane row
CONF_OFF = 0       # lanes [0, 15)  : per-bin confidence sums
COUNT_OFF = 32     # lanes [32, 47) : per-bin sample counts
ACC_OFF = 64       # lanes [64, 79) : per-bin accuracy sums


def _ece_block_kernel(n_total, block_m, sub, logits_ref, labels_ref, out_ref):
    """One grid step: lane-packed partial bin histogram for this sample block."""
    i = pl.program_id(0)
    n_sub = block_m // sub
    ncls = logits_ref.shape[-1]

    # Hoisted constants (JAX does not CSE broadcast_in_dim inside the loop).
    lane = lax.broadcasted_iota(jnp.int32, (sub, LANES), 1)
    col_ids = lax.broadcasted_iota(jnp.int32, (sub, ncls), 1)
    local = lax.broadcasted_iota(jnp.int32, (sub, 1), 0)
    base = i * block_m

    def body(s, hist):
        row0 = pl.multiple_of(s * sub, sub)
        x = logits_ref[pl.ds(row0, sub), :].astype(jnp.float32)      # (sub, C)
        labels = labels_ref[pl.ds(row0, sub), :]                     # (sub, 1)

        # confidence = max softmax prob = 1 / sum(exp(x - row_max))
        row_max = jnp.max(x, axis=-1, keepdims=True)
        sum_exp = jnp.sum(jnp.exp(x - row_max), axis=-1, keepdims=True)
        # exact reciprocal: ~1e-4 approx error could flip a 1/15 bin boundary
        conf = pl.reciprocal(sum_exp, approx=False)                  # (sub, 1)

        # prediction = first argmax index (matches torch.max tie-breaking)
        masked_ids = jnp.where(x == row_max, col_ids, ncls)
        preds = jnp.min(masked_ids, axis=-1, keepdims=True)          # (sub, 1)
        acc = (preds == labels).astype(jnp.float32)                  # (sub, 1)

        # mask padded tail rows out of every bin
        valid = (base + row0 + local) < n_total                      # (sub, 1)
        conf_m = jnp.where(valid, conf, 0.0)
        acc_m = jnp.where(valid, acc, 0.0)

        # single-compare binning: bin k covers (k/15, (k+1)/15]
        bin_idx = jnp.ceil(conf * float(N_BINS)).astype(jnp.int32) - 1
        bin_idx = jnp.where(valid, bin_idx, -1)                      # hits no lane
        onehot = (lane == bin_idx).astype(jnp.float32)               # (sub, 128)

        # pack conf-sum / count / acc-sum at lane offsets 0 / 32 / 64; the
        # lane shifts run on the idle XLU, leaving a single sublane reduction.
        packed = (onehot * conf_m
                  + pltpu.roll(onehot, COUNT_OFF, axis=1)
                  + pltpu.roll(onehot * acc_m, ACC_OFF, axis=1))
        return hist + jnp.sum(packed, axis=0, keepdims=True)

    unroll = n_sub if n_sub <= 8 else 4
    hist = lax.fori_loop(0, n_sub, body, jnp.zeros((1, LANES), jnp.float32),
                         unroll=unroll)
    out_ref[...] = hist.reshape(1, 1, LANES)                         # one store


def _round_up(x, m):
    return ((x + m - 1) // m) * m


def _vmem_capacity_bytes():
    try:
        return int(pltpu.get_tpu_info().vmem_capacity_bytes)
    except Exception:
        return 64 * 1024 * 1024        # conservative: v7x per-TC physical VMEM


def _choose_sub(c):
    # ~6 live (sub, C)-sized 32-bit temporaries in the inner loop; keep them
    # ~<= 10 MiB so they never squeeze block_m on v7x's 64 MiB VMEM.
    if c <= 2048:
        return 256
    if c <= 4096:
        return 128
    return 64


def _choose_block_m(n, c, itemsize, sub, vmem_cap):
    temps = 6 * sub * max(c, LANES) * 4                 # in-kernel temporaries
    reserve = 8 * 1024 * 1024                           # compiler scratch/slack
    avail = max(vmem_cap - reserve - temps, 4 * 1024 * 1024)
    # Double-buffered logits block + double-buffered lane-padded labels block.
    per_row = 2 * c * itemsize + 2 * LANES * 4
    vmem_rows = max(sub, int(avail // per_row))
    # Move >= ~4 MiB of logits per grid step so per-step overhead is <10% of
    # the DMA time for small C (no flat 2048-row cap).
    target_rows = max(2048, (4 * 1024 * 1024) // (c * itemsize))
    bm = min(vmem_rows, target_rows)
    bm = min(bm, _round_up(n, sub))
    if n >= 2 * sub:                                    # keep >= 2 blocks so the
        bm = min(bm, _round_up(-(-n // 2), sub))        # v7x megacore can shard
    return max(sub, (bm // sub) * sub)


def ece_loss(logits, labels, *, block_m=None):
    """Expected Calibration Error. logits: (N, C) float, labels: (N,) int."""
    n, c = logits.shape
    itemsize = jnp.dtype(logits.dtype).itemsize
    sub = _choose_sub(c)
    vmem_cap = _vmem_capacity_bytes()
    if block_m is None:
        block_m = _choose_block_m(n, c, itemsize, sub, vmem_cap)
    assert block_m % sub == 0

    n_pad = _round_up(n, block_m)
    if n_pad != n:
        logits = jnp.pad(logits, ((0, n_pad - n), (0, 0)))
        labels = jnp.pad(labels, ((0, n_pad - n),))
    labels2d = labels.astype(jnp.int32).reshape(n_pad, 1)
    n_blocks = n_pad // block_m

    # Claim only the actual working set (+ slack), not the whole VMEM.
    temps = 6 * sub * max(c, LANES) * 4
    working = (2 * block_m * c * itemsize          # double-buffered logits
               + 2 * block_m * LANES * 4           # double-buffered padded labels
               + temps)
    vmem_limit = int(min(max(working + (8 << 20), 16 << 20),
                         vmem_cap - (4 << 20)))

    kernel = functools.partial(_ece_block_kernel, n, block_m, sub)
    partials = pl.pallas_call(
        kernel,
        out_shape=jax.ShapeDtypeStruct((n_blocks, 1, LANES), jnp.float32),
        grid_spec=pltpu.PrefetchScalarGridSpec(
            num_scalar_prefetch=0,
            grid=(n_blocks,),
            in_specs=[
                pl.BlockSpec((block_m, c), lambda i: (i, 0)),
                pl.BlockSpec((block_m, 1), lambda i: (i, 0)),
            ],
            out_specs=pl.BlockSpec((1, 1, LANES), lambda i: (i, 0, 0)),
        ),
        compiler_params=pltpu.CompilerParams(
            dimension_semantics=("parallel",),
            vmem_limit_bytes=vmem_limit),
    )(logits, labels2d)

    # Tiny 15-bin finalize on the summed lane-packed partials.
    totals = jnp.sum(partials, axis=(0, 1))                      # (128,)
    cnt = totals[COUNT_OFF:COUNT_OFF + N_BINS]
    conf_sum = totals[CONF_OFF:CONF_OFF + N_BINS]
    acc_sum = totals[ACC_OFF:ACC_OFF + N_BINS]
    prop = cnt / jnp.float32(n)
    safe = jnp.maximum(cnt, 1.0)
    gaps = jnp.where(cnt > 0,
                     jnp.abs(conf_sum / safe - acc_sum / safe) * prop, 0.0)
    return jnp.sum(gaps).reshape(1)   # matches torch.zeros(1)-shaped return


def _ece_ref(logits, labels):
    softm = jax.nn.softmax(logits.astype(jnp.float32), axis=-1)
    conf = jnp.max(softm, axis=-1)
    preds = jnp.argmax(softm, axis=-1)
    accs = (preds == labels).astype(jnp.float32)
    bounds = jnp.linspace(0.0, 1.0, N_BINS + 1)
    ece = jnp.zeros(1, jnp.float32)
    for b in range(N_BINS):
        in_bin = (conf > bounds[b]) & (conf <= bounds[b + 1])
        prop = jnp.mean(in_bin.astype(jnp.float32))
        cnt = jnp.sum(in_bin.astype(jnp.float32))
        acc_in = jnp.sum(jnp.where(in_bin, accs, 0.0)) / jnp.maximum(cnt, 1.0)
        conf_in = jnp.sum(jnp.where(in_bin, conf, 0.0)) / jnp.maximum(cnt, 1.0)
        ece = ece + jnp.where(cnt > 0, jnp.abs(conf_in - acc_in) * prop, 0.0)
    return ece


if __name__ == "__main__":
    key = jax.random.PRNGKey(0)
    k1, k2 = jax.random.split(key)
    N, C = 128, 32
    logits = jax.random.normal(k1, (N, C), dtype=jnp.float32) * 3.0
    labels = jax.random.randint(k2, (N,), 0, C, dtype=jnp.int32)

    out = jax.block_until_ready(ece_loss(logits, labels))
    ref = jax.block_until_ready(_ece_ref(logits, labels))
    assert out.shape == (1,)
    assert jnp.allclose(out, ref, atol=1e-5, rtol=1e-5), (out, ref)

    # Exercise the padded-tail / multi-sub-chunk path (N not a block multiple).
    k3, k4 = jax.random.split(k2)
    N2, C2 = 300, 10
    logits2 = jax.random.normal(k3, (N2, C2), dtype=jnp.float32) * 2.0
    labels2 = jax.random.randint(k4, (N2,), 0, C2, dtype=jnp.int32)
    out2 = jax.block_until_ready(ece_loss(logits2, labels2))
    ref2 = jax.block_until_ready(_ece_ref(logits2, labels2))
    assert jnp.allclose(out2, ref2, atol=1e-5, rtol=1e-5), (out2, ref2)

    print("KERNEL_OK")
</pallas_src>

<mosaic_0001>
module attributes {stable_mosaic.version = 11 : i64} {
  func.func @_ece_block_kernel(%arg0: i32, %arg1: memref<256x32xf32, #tpu.memory_space<vmem>>, %arg2: memref<256x1xi32, #tpu.memory_space<vmem>>, %arg3: memref<1x1x128xf32, #tpu.memory_space<vmem>>) attributes {dimension_semantics = [#tpu.dimension_semantics<parallel>], iteration_bounds = array<i64: 1>, scalar_prefetch = 0 : i64, scratch_operands = 0 : i64, tpu.core_type = #tpu.core_type<tc>, window_params = [{transform_indices = @transform_0, window_bounds = array<i64: 256, 32>}, {transform_indices = @transform_1, window_bounds = array<i64: 256, 1>}, {transform_indices = @transform_2, window_bounds = array<i64: 1, 1, 128>}]} {
    %0 = tpu.iota {dimensions = array<i32: 1>} : vector<256x128xi32>
    %1 = tpu.iota {dimensions = array<i32: 1>} : vector<256x32xi32>
    %2 = tpu.iota {dimensions = array<i32: 0>} : vector<256x1xi32>
    %c256_i32 = arith.constant 256 : i32
    %3 = arith.muli %arg0, %c256_i32 : i32
    %cst = arith.constant 0.000000e+00 : f32
    %4 = vector.broadcast %cst : f32 to vector<1x128xf32>
    %c0_i32 = arith.constant 0 : i32
    %c256_i32_0 = arith.constant 256 : i32
    %5 = arith.muli %c0_i32, %c256_i32_0 : i32
    %6 = tpu.assume_multiple %5, 256 : i32
    %7 = arith.index_cast %6 : i32 to index
    %c0 = arith.constant 0 : index
    %8 = vector.load %arg1[%7, %c0] : memref<256x32xf32, #tpu.memory_space<vmem>>, vector<256x32xf32>
    %9 = arith.index_cast %6 : i32 to index
    %c0_1 = arith.constant 0 : index
    %10 = vector.load %arg2[%9, %c0_1] : memref<256x1xi32, #tpu.memory_space<vmem>>, vector<256x1xi32>
    %cst_2 = arith.constant dense<0xFF800000> : vector<256xf32>
    %11 = vector.multi_reduction <maximumf>, %8, %cst_2 [1] : vector<256x32xf32> to vector<256xf32>
    %12 = vector.shape_cast %11 : vector<256xf32> to vector<256x1xf32>
    %13 = vector.broadcast %12 : vector<256x1xf32> to vector<256x32xf32>
    %14 = arith.subf %8, %13 : vector<256x32xf32>
    %15 = math.exp %14 : vector<256x32xf32>
    %cst_3 = arith.constant dense<0.000000e+00> : vector<256xf32>
    %16 = vector.multi_reduction <add>, %15, %cst_3 [1] : vector<256x32xf32> to vector<256xf32>
    %17 = vector.shape_cast %16 : vector<256xf32> to vector<256x1xf32>
    %18 = tpu.reciprocal %17 : vector<256x1xf32> -> vector<256x1xf32>
    %19 = vector.broadcast %12 : vector<256x1xf32> to vector<256x32xf32>
    %20 = arith.cmpf oeq, %8, %19 : vector<256x32xf32>
    %c32_i32 = arith.constant 32 : i32
    %21 = vector.broadcast %c32_i32 : i32 to vector<256x32xi32>
    %22 = arith.select %20, %1, %21 : vector<256x32xi1>, vector<256x32xi32>
    %cst_4 = arith.constant dense<2147483647> : vector<256xi32>
    %23 = vector.multi_reduction <minsi>, %22, %cst_4 [1] : vector<256x32xi32> to vector<256xi32>
    %24 = vector.shape_cast %23 : vector<256xi32> to vector<256x1xi32>
    %25 = arith.cmpi eq, %24, %10 : vector<256x1xi32>
    %26 = arith.extui %25 : vector<256x1xi1> to vector<256x1xi32>
    %27 = arith.sitofp %26 : vector<256x1xi32> to vector<256x1xf32>
    %28 = arith.addi %3, %6 : i32
    %29 = vector.broadcast %28 : i32 to vector<256x1xi32>
    %30 = arith.addi %29, %2 : vector<256x1xi32>
    %c128_i32 = arith.constant 128 : i32
    %31 = vector.broadcast %c128_i32 : i32 to vector<256x1xi32>
    %32 = arith.cmpi slt, %30, %31 : vector<256x1xi32>
    %cst_5 = arith.constant 0.000000e+00 : f32
    %33 = vector.broadcast %cst_5 : f32 to vector<256x1xf32>
    %34 = arith.select %32, %18, %33 : vector<256x1xi1>, vector<256x1xf32>
    %cst_6 = arith.constant 0.000000e+00 : f32
    %35 = vector.broadcast %cst_6 : f32 to vector<256x1xf32>
    %36 = arith.select %32, %27, %35 : vector<256x1xi1>, vector<256x1xf32>
    %cst_7 = arith.constant 1.500000e+01 : f32
    %37 = vector.broadcast %cst_7 : f32 to vector<256x1xf32>
    %38 = arith.mulf %18, %37 : vector<256x1xf32>
    %39 = math.ceil %38 : vector<256x1xf32>
    %40 = arith.fptosi %39 : vector<256x1xf32> to vector<256x1xi32>
    %c1_i32 = arith.constant 1 : i32
    %41 = vector.broadcast %c1_i32 : i32 to vector<256x1xi32>
    %42 = arith.subi %40, %41 : vector<256x1xi32>
    %c-1_i32 = arith.constant -1 : i32
    %43 = vector.broadcast %c-1_i32 : i32 to vector<256x1xi32>
    %44 = arith.select %32, %42, %43 : vector<256x1xi1>, vector<256x1xi32>
    %45 = vector.broadcast %44 : vector<256x1xi32> to vector<256x128xi32>
    %46 = arith.cmpi eq, %0, %45 : vector<256x128xi32>
    %47 = arith.extui %46 : vector<256x128xi1> to vector<256x128xi32>
    %48 = arith.sitofp %47 : vector<256x128xi32> to vector<256x128xf32>
    %49 = vector.broadcast %34 : vector<256x1xf32> to vector<256x128xf32>
    %50 = arith.mulf %48, %49 : vector<256x128xf32>
    %c32_i32_8 = arith.constant 32 : i32
    %51 = tpu.dynamic_rotate %48 by %c32_i32_8 dim 1 : vector<256x128xf32>, i32 -> vector<256x128xf32>
    %52 = arith.addf %50, %51 : vector<256x128xf32>
    %53 = vector.broadcast %36 : vector<256x1xf32> to vector<256x128xf32>
    %54 = arith.mulf %48, %53 : vector<256x128xf32>
    %c64_i32 = arith.constant 64 : i32
    %55 = tpu.dynamic_rotate %54 by %c64_i32 dim 1 : vector<256x128xf32>, i32 -> vector<256x128xf32>
    %56 = arith.addf %52, %55 : vector<256x128xf32>
    %cst_9 = arith.constant dense<0.000000e+00> : vector<128xf32>
    %57 = vector.multi_reduction <add>, %56, %cst_9 [0] : vector<256x128xf32> to vector<128xf32>
    %58 = vector.shape_cast %57 : vector<128xf32> to vector<1x128xf32>
    %59 = arith.addf %4, %58 : vector<1x128xf32>
    %c1_i32_10 = arith.constant 1 : i32
    %60 = vector.shape_cast %59 : vector<1x128xf32> to vector<1x1x128xf32>
    %c0_11 = arith.constant 0 : index
    %c0_12 = arith.constant 0 : index
    %c0_13 = arith.constant 0 : index
    %61 = vector.load %arg3[%c0_11, %c0_12, %c0_13] : memref<1x1x128xf32, #tpu.memory_space<vmem>>, vector<1x1x128xf32>
    tpu.vector_store %arg3[%c0_11, %c0_12, %c0_13], %60 {strides = array<i32>} : memref<1x1x128xf32, #tpu.memory_space<vmem>>, vector<1x1x128xf32>,
    return
  }
  func.func @transform_0(%arg0: i32) -> (i32, i32) {
    %c0_i32 = arith.constant 0 : i32
    %c0_i32_0 = arith.constant 0 : i32
    return %arg0, %c0_i32 : i32, i32
  }
  func.func @transform_1(%arg0: i32) -> (i32, i32) {
    %c0_i32 = arith.constant 0 : i32
    %c0_i32_0 = arith.constant 0 : i32
    return %arg0, %c0_i32 : i32, i32
  }
  func.func @transform_2(%arg0: i32) -> (i32, i32, i32) {
    %c0_i32 = arith.constant 0 : i32
    %c0_i32_0 = arith.constant 0 : i32
    %c0_i32_1 = arith.constant 0 : i32
    return %arg0, %c0_i32, %c0_i32_0 : i32, i32, i32
  }
}

</mosaic_0001>

<bundles_post_ra>
// kernel: tpu_custom_call.1
= control target key start
LH: loop header
LB: loop body
LE: loop exit
PB: predicated region body
PF: predicated region fallthrough
CT: control target
= control target key end

     0   :  { %vm112_vm0 = vcmask 261120   ;;  %s3255_s0 = inlined_call_operand.vmem [shape: f32[256,32], index: 0, kind: input, shape index: {}]   ;;  %s3256_s1 = inlined_call_operand.vmem [shape: s32[256,1], index: 1, kind: input, shape index: {}]   ;;  %s3257_s2 = inlined_call_operand.hbm [shape: f32[1,1,128], index: 2, kind: output, shape index: {}]  }
   0x1   :  { %v2348_v0 = vld [vmem:[%s3255_s0] sm:$0xff]  ;;  %v2353_v1 = vld [vmem:[%s3255_s0 + $0x10] sm:$0xff]  ;;  %v2358_v2 = vld [vmem:[%s3255_s0 + $0x8] sm:$0xff] }
   0x2   :  { %v113_v3 = vsel %vm112_vm0, %v2348_v0, -inf  ;;  %v119_v4 = vsel %vm112_vm0, %v2353_v1, -inf  ;;  %v2367_v5 = vld [vmem:[%s3255_s0 + $0x18] sm:$0xff]  ;;  %v116_v6 = vsel %vm112_vm0, %v2358_v2, -inf  ;;  %v2376_v8 = vld [vmem:[%s3255_s0 + $0x20] sm:$0xff]  ;;  %v2381_v9 = vld [vmem:[%s3255_s0 + $0x28] sm:$0xff] }
   0x3   :  { %114 = vmax.xlane.f32.xlu0 %v113_v3  ;;  %120 = vmax.xlane.f32.xlu1 %v119_v4  ;;  %v122_v7 = vsel %vm112_vm0, %v2367_v5, -inf }
   0x4   :  { %7 = vsyncpa [#allocation3], 0  ;;  %v125_v10 = vsel %vm112_vm0, %v2376_v8, -inf  ;;  %v128_v11 = vsel %vm112_vm0, %v2381_v9, -inf  ;;  %v2390_v12 = vld [vmem:[%s3255_s0 + $0x30] sm:$0xff]  ;;  %v2395_v13 = vld [vmem:[%s3255_s0 + $0x38] sm:$0xff]  ;;  %v12_v32 = vlaneseq }
   0x5   :  { %v131_v14 = vsel %vm112_vm0, %v2390_v12, -inf  ;;  %v134_v15 = vsel %vm112_vm0, %v2395_v13, -inf  ;;  %v2404_v16 = vld [vmem:[%s3255_s0 + $0x40] sm:$0xff]  ;;  %v2409_v17 = vld [vmem:[%s3255_s0 + $0x48] sm:$0xff]  ;;  %v2418_v20 = vld [vmem:[%s3255_s0 + $0x50] sm:$0xff] }
   0x6   :  { %v137_v18 = vsel %vm112_vm0, %v2404_v16, -inf  ;;  %v140_v19 = vsel %vm112_vm0, %v2409_v17, -inf  ;;  %v2423_v21 = vld [vmem:[%s3255_s0 + $0x58] sm:$0xff]  ;;  %v143_v22 = vsel %vm112_vm0, %v2418_v20, -inf  ;;  %v2432_v24 = vld [vmem:[%s3255_s0 + $0x60] sm:$0xff]  ;;  %v2437_v25 = vld [vmem:[%s3255_s0 + $0x68] sm:$0xff] }
   0x7   :  { %117 = vmax.xlane.f32.xlu0 %v116_v6  ;;  %123 = vmax.xlane.f32.xlu1 %v122_v7  ;;  %v146_v23 = vsel %vm112_vm0, %v2423_v21, -inf  ;;  %v149_v26 = vsel %vm112_vm0, %v2432_v24, -inf  ;;  %v152_v27 = vsel %vm112_vm0, %v2437_v25, -inf  ;;  %v2446_v28 = vld [vmem:[%s3255_s0 + $0x70] sm:$0xff]  ;;  %v2451_v29 = vld [vmem:[%s3255_s0 + $0x78] sm:$0xff]  ;;  %v2457_v33 = vand.u32 127, %v12_v32 }
   0x8   :  { %v155_v30 = vsel %vm112_vm0, %v2446_v28, -inf  ;;  %v158_v31 = vsel %vm112_vm0, %v2451_v29, -inf  ;;  %s2326_s0 = smov 32  }
   0x9   :  { %3272 = vst [vmem:[#allocation5_spill] sm:$0xff] %v2457_v33 }
   0xb   :  { %126 = vmax.xlane.f32.xlu0 %v125_v10  ;;  %129 = vmax.xlane.f32.xlu1 %v128_v11 }
   0xf   :  { %132 = vmax.xlane.f32.xlu0 %v131_v14  ;;  %135 = vmax.xlane.f32.xlu1 %v134_v15 }
  0x13   :  { %138 = vmax.xlane.f32.xlu0 %v137_v18  ;;  %141 = vmax.xlane.f32.xlu1 %v140_v19 }
  0x17   :  { %144 = vmax.xlane.f32.xlu0 %v143_v22  ;;  %147 = vmax.xlane.f32.xlu1 %v146_v23 }
  0x1b   :  { %150 = vmax.xlane.f32.xlu0 %v149_v26  ;;  %153 = vmax.xlane.f32.xlu1 %v152_v27 }
  0x1f   :  { %156 = vmax.xlane.f32.xlu0 %v155_v30  ;;  %159 = vmax.xlane.f32.xlu1 %v158_v31 }
  0x8c   :  { %v2459_v34 = vpop.xlane.xlu0 %114  ;;  %v2461_v35 = vpop.xlane.xlu1 %120 }
  0x8d   :  { %vm433_vm1 = vcmp.eq.f32.partialorder %v2348_v0, %v2459_v34  ;;  %vm435_vm2 = vcmp.eq.f32.partialorder %v2353_v1, %v2461_v35 }
  0x8e   :  { %v465_v36 = vsel %vm433_vm1, %v2457_v33, 32  ;;  %v467_v37 = vsel %vm435_vm2, %v2457_v33, 32 }
  0x8f   :  { %v2470_v38 = vsel %vm112_vm0, %v465_v36, 2147483647  ;;  %v2480_v42 = vsel %vm112_vm0, %v467_v37, 2147483647 }
  0x90   :  { %v2472_v39 = vpop.xlane.xlu0 %117  ;;  %v2474_v40 = vpop.xlane.xlu1 %123  ;;  %v499_v41 = vshra.s32 %v2470_v38, 16  ;;  %v529_v49 = vshra.s32 %v2480_v42, 16 }
  0x91   :  { %vm434_vm3 = vcmp.eq.f32.partialorder %v2358_v2, %v2472_v39  ;;  %vm436_vm4 = vcmp.eq.f32.partialorder %v2367_v5, %v2474_v40 }
  0x92   :  { %v2484_v43 = vcvt.s32.f32 %v499_v41  ;;  %v466_v44 = vsel %vm434_vm3, %v2457_v33, 32  ;;  %v468_v50 = vsel %vm436_vm4, %v2457_v33, 32  ;;  %v2504_v52 = vcvt.s32.f32 %v529_v49 }
  0x93   :  { %v2488_v45 = vsel %vm112_vm0, %v466_v44, 2147483647  ;;  %v2507_v53 = vsel %vm112_vm0, %v468_v50, 2147483647 }
  0x94   :  { %v2490_v46 = vpop.xlane.xlu0 %126  ;;  %502 = vmin.xlane.f32.xlu1 %v2484_v43  ;;  %v2493_v47 = vpop.xlane.xlu1 %129  ;;  %v514_v48 = vshra.s32 %v2488_v45, 16  ;;  %v544_v56 = vshra.s32 %v2507_v53, 16 }
  0x95   :  { %vm437_vm5 = vcmp.eq.f32.partialorder %v2376_v8, %v2490_v46  ;;  %vm438_vm6 = vcmp.eq.f32.partialorder %v2381_v9, %v2493_v47 }
  0x96   :  { %v2502_v51 = vcvt.s32.f32 %v514_v48  ;;  %v469_v57 = vsel %vm437_vm5, %v2457_v33, 32  ;;  %v470_v58 = vsel %vm438_vm6, %v2457_v33, 32  ;;  %v2522_v59 = vcvt.s32.f32 %v544_v56 }
  0x97   :  { %v2525_v60 = vsel %vm112_vm0, %v469_v57, 2147483647  ;;  %v2535_v4 = vsel %vm112_vm0, %v470_v58, 2147483647 }
  0x98   :  { %v2509_v54 = vpop.xlane.xlu0 %132  ;;  %517 = vmin.xlane.f32.xlu0 %v2502_v51  ;;  %532 = vmin.xlane.f32.xlu1 %v2504_v52  ;;  %v2513_v55 = vpop.xlane.xlu1 %135  ;;  %v559_v61 = vshra.s32 %v2525_v60, 16  ;;  %v574_v11 = vshra.s32 %v2535_v4, 16 }
  0x99   :  { %vm439_vm7 = vcmp.eq.f32.partialorder %v2390_v12, %v2509_v54  ;;  %vm440_vm8 = vcmp.eq.f32.partialorder %v2395_v13, %v2513_v55 }
  0x9a   :  { %v471_v62 = vsel %vm439_vm7, %v2457_v33, 32  ;;  %v472_v7 = vsel %vm440_vm8, %v2457_v33, 32  ;;  %v2543_v10 = vcvt.s32.f32 %v559_v61  ;;  %v2556_v22 = vcvt.s32.f32 %v574_v11 }
  0x9b   :  { %v2538_v6 = vsel %vm112_vm0, %v471_v62, 2147483647  ;;  %v2549_v15 = vsel %vm112_vm0, %v472_v7, 2147483647 }
  0x9c   :  { %v2529_v63 = vpop.xlane.xlu0 %138  ;;  %547 = vmin.xlane.f32.xlu0 %v2522_v59  ;;  %v2532_v3 = vpop.xlane.xlu1 %141  ;;  %562 = vmin.xlane.f32.xlu1 %v2543_v10  ;;  %v589_v14 = vshra.s32 %v2538_v6, 16  ;;  %v604_v26 = vshra.s32 %v2549_v15, 16 }
  0x9d   :  { %vm441_vm9 = vcmp.eq.f32.partialorder %v2404_v16, %v2529_v63  ;;  %vm442_vm10 = vcmp.eq.f32.partialorder %v2409_v17, %v2532_v3 }
  0x9e   :  { %v473_v18 = vsel %vm441_vm9, %v2457_v33, 32  ;;  %v2566_v30 = vcvt.s32.f32 %v589_v14  ;;  %v2569_v31 = vcvt.s32.f32 %v604_v26  ;;  %v474_v36 = vsel %vm442_vm10, %v2457_v33, 32 }
  0x9f   :  { %v2562_v27 = vsel %vm112_vm0, %v473_v18, 2147483647  ;;  %v2582_v48 = vsel %vm112_vm0, %v474_v36, 2147483647 }
  0xa0   :  { %v2554_v19 = vpop.xlane.xlu0 %144  ;;  %v2558_v23 = vpop.xlane.xlu1 %147  ;;  %577 = vmin.xlane.f32.xlu0 %v2556_v22  ;;  %592 = vmin.xlane.f32.xlu1 %v2566_v30  ;;  %v619_v32 = vshra.s32 %v2562_v27, 16  ;;  %v634_v56 = vshra.s32 %v2582_v48, 16 }
  0xa1   :  { %vm443_vm11 = vcmp.eq.f32.partialorder %v2418_v20, %v2554_v19  ;;  %vm444_vm12 = vcmp.eq.f32.partialorder %v2423_v21, %v2558_v23 }
  0xa2   :  { %v475_v37 = vsel %vm443_vm11, %v2457_v33, 32  ;;  %v2589_v50 = vcvt.s32.f32 %v619_v32  ;;  %v476_v58 = vsel %vm444_vm12, %v2457_v33, 32  ;;  %v2601_v7 = vcvt.s32.f32 %v634_v56 }
  0xa3   :  { %v2585_v49 = vsel %vm112_vm0, %v475_v37, 2147483647  ;;  %v2606_v14 = vsel %vm112_vm0, %v476_v58, 2147483647 }
  0xa4   :  { %v2577_v41 = vpop.xlane.xlu0 %150  ;;  %v2579_v44 = vpop.xlane.xlu1 %153  ;;  %3273 = vst [vmem:[#allocation6_spill] sm:$0xff] %v2589_v50  ;;  %607 = vmin.xlane.f32.xlu0 %v2569_v31  ;;  %622 = vmin.xlane.f32.xlu1 %v2589_v50  ;;  %v649_v57 = vshra.s32 %v2585_v49, 16  ;;  %3274 = vst [vmem:[#allocation7_spill] sm:$0xff] %v2601_v7  ;;  %v664_v32 = vshra.s32 %v2606_v14, 16 }
  0xa5   :  { %vm445_vm13 = vcmp.eq.f32.partialorder %v2432_v24, %v2577_v41  ;;  %vm446_vm14 = vcmp.eq.f32.partialorder %v2437_v25, %v2579_v44  ;;  %3275 = vst [vmem:[#allocation8_spill] sm:$0xff] %v2606_v14 }
  0xa6   :  { %v477_v61 = vsel %vm445_vm13, %v2457_v33, 32  ;;  %v2613_v26 = vcvt.s32.f32 %v649_v57  ;;  %v478_v37 = vsel %vm446_vm14, %v2457_v33, 32  ;;  %v2623_v58 = vcvt.s32.f32 %v664_v32 }
  0xa7   :  { %v2609_v18 = vsel %vm112_vm0, %v477_v61, 2147483647  ;;  %v2626_v57 = vsel %vm112_vm0, %v478_v37, 2147483647 }
  0xa8   :  { %v2599_v62 = vpop.xlane.xlu0 %156  ;;  %v2603_v11 = vpop.xlane.xlu1 %159  ;;  %3276 = vst [vmem:[#allocation9_spill] sm:$0xff] %v2609_v18  ;;  %3277 = vst [vmem:[#allocation10_spill] sm:$0xff] %v2613_v26  ;;  %637 = vmin.xlane.f32.xlu0 %v2601_v7  ;;  %652 = vmin.xlane.f32.xlu1 %v2613_v26  ;;  %v679_v36 = vshra.s32 %v2609_v18, 16  ;;  %v694_v26 = vshra.s32 %v2626_v57, 16 }
  0xa9   :  { %vm447_vm15 = vcmp.eq.f32.partialorder %v2446_v28, %v2599_v62  ;;  %vm448_vm1 = vcmp.eq.f32.partialorder %v2451_v29, %v2603_v11 }
  0xaa   :  { %v479_v56 = vsel %vm447_vm15, %v2457_v33, 32  ;;  %v2631_v7 = vcvt.s32.f32 %v679_v36  ;;  %v480_v18 = vsel %vm448_vm1, %v2457_v33, 32  ;;  %v2638_v32 = vcvt.s32.f32 %v694_v26 }
  0xab   :  { %v2629_v61 = vsel %vm112_vm0, %v479_v56, 2147483647  ;;  %v2643_v37 = vsel %vm112_vm0, %v480_v18, 2147483647  ;;  %v3269_v33 = vmov 0.0   ;;  %v209_v18 = vsub.f32 %v2348_v0, %v2459_v34 }
  0xac   :  { %v709_v14 = vshra.s32 %v2629_v61, 16  ;;  %667 = vmin.xlane.f32.xlu0 %v2623_v58  ;;  %682 = vmin.xlane.f32.xlu1 %v2631_v7  ;;  %3278 = vst [vmem:[#allocation11_spill] sm:$0xff] %v2638_v32  ;;  %3280 = vst [vmem:[#allocation13_spill] sm:$0xff] %v2643_v37  ;;  %v724_v36 = vshra.s32 %v2643_v37, 16  ;;  %v216_v34 = vsub.f32 %v2395_v13, %v2513_v55 }
  0xad   :  { %v241_v37 = vmul.f32 1.442695, %v209_v18  ;;  %v220_v13 = vsub.f32 %v2423_v21, %v2558_v23  ;;  %v221_v21 = vsub.f32 %v2432_v24, %v2577_v41 }
  0xae   :  { %v2640_v50 = vcvt.s32.f32 %v709_v14  ;;  %v2647_v56 = vcvt.s32.f32 %v724_v36  ;;  %v210_v14 = vsub.f32 %v2358_v2, %v2472_v39  ;;  %v212_v36 = vsub.f32 %v2367_v5, %v2474_v40 }
  0xaf   :  { %v213_v2 = vsub.f32 %v2376_v8, %v2490_v46  ;;  %v217_v8 = vsub.f32 %v2404_v16, %v2529_v63 }
  0xb0   :  { %3279 = vst [vmem:[#allocation12_spill] sm:$0xff] %v2640_v50  ;;  %697 = vmin.xlane.f32.xlu0 %v2638_v32  ;;  %3281 = vst [vmem:[#allocation14_spill] sm:$0xff] %v2647_v56  ;;  %712 = vmin.xlane.f32.xlu1 %v2640_v50  ;;  %v243_v26 = vmul.f32 1.442695, %v210_v14  ;;  %v247_v50 = vmul.f32 1.442695, %v212_v36  ;;  %v214_v32 = vsub.f32 %v2381_v9, %v2493_v47 }
  0xb1   :  { %v249_v5 = vmul.f32 1.442695, %v213_v2  ;;  %v218_v9 = vsub.f32 %v2409_v17, %v2532_v3  ;;  %v257_v46 = vmul.f32 1.442695, %v217_v8  ;;  %v222_v17 = vsub.f32 %v2437_v25, %v2579_v44 }
  0xb2   :  { %2207 = vpow2.f32 %v243_v26  ;;  %v251_v0 = vmul.f32 1.442695, %v214_v32  ;;  %v223_v32 = vsub.f32 %v2446_v28, %v2599_v62 }
  0xb3   :  { %2209 = vpow2.f32 %v241_v37  ;;  %v259_v40 = vmul.f32 1.442695, %v218_v9 }
  0xb4   :  { %727 = vmin.xlane.f32.xlu0 %v2647_v56  ;;  %v211_v56 = vsub.f32 %v2353_v1, %v2461_v35  ;;  %2211 = vpow2.f32 %v247_v50  ;;  %v215_v1 = vsub.f32 %v2390_v12, %v2509_v54  ;;  %v255_v35 = vmul.f32 1.442695, %v216_v34 }
  0xb5   :  { %v219_v12 = vsub.f32 %v2418_v20, %v2554_v19  ;;  %v263_v54 = vmul.f32 1.442695, %v220_v13  ;;  %v267_v20 = vmul.f32 1.442695, %v222_v17  ;;  %v224_v19 = vsub.f32 %v2451_v29, %v2603_v11 }
  0xb6   :  { %v253_v39 = vmul.f32 1.442695, %v215_v1  ;;  %v265_v50 = vmul.f32 1.442695, %v221_v21  ;;  %v269_v29 = vmul.f32 1.442695, %v223_v32 }
  0xb7   :  { %v261_v63 = vmul.f32 1.442695, %v219_v12  ;;  %v271_v37 = vmul.f32 1.442695, %v224_v19 }
  0xc1   :  { %2051 = vrot.lane.b32.xlu1 %v3269_v33, %s2326_s0 }
  0xca   :  { %2046 = vrot.lane.b32.xlu0 %v3269_v33, %s2326_s0  ;;  %v245_v33 = vmul.f32 1.442695, %v211_v56 }
  0xcc   :  { %2213 = vpow2.f32 %v245_v33  ;;  %v2208_v33 = vpop.eup %2207 }
  0xcd   :  { %2215 = vpow2.f32 %v251_v0  ;;  %v2210_v47 = vpop.eup %2209  ;;  %v308_v55 = vsel %vm112_vm0, %v2208_v33, 0.0 }
  0xce   :  { %2217 = vpow2.f32 %v249_v5  ;;  %v2212_v16 = vpop.eup %2211  ;;  %v305_v3 = vsel %vm112_vm0, %v2210_v47, 0.0  ;;  %v498_v47 = vand.u32 65535, %v2470_v38  ;;  %v543_v38 = vand.u32 65535, %v2507_v53 }
  0xcf   :  { %2219 = vpow2.f32 %v255_v35  ;;  %v314_v25 = vsel %vm112_vm0, %v2212_v16, 0.0  ;;  %v528_v16 = vand.u32 65535, %v2480_v42  ;;  %v573_v53 = vand.u32 65535, %v2535_v4 }
  0xd0   :  { %2221 = vpow2.f32 %v253_v39  ;;  %v500_v17 = vcvt.s32.f32 %v498_v47 }
  0xd1   :  { %2223 = vpow2.f32 %v259_v40 }
  0xd2   :  { %2225 = vpow2.f32 %v257_v46 }
  0xd3   :  { %2227 = vpow2.f32 %v263_v54 }
  0xd4   :  { %2229 = vpow2.f32 %v261_v63 }
  0xd5   :  { %2231 = vpow2.f32 %v267_v20  ;;  %v530_v20 = vcvt.s32.f32 %v528_v16  ;;  %v3288_v16 = vld [vmem:[#allocation12_spill] sm:$0xff] }
  0xd6   :  { %2233 = vpow2.f32 %v265_v50 }
  0xd7   :  { %2235 = vpow2.f32 %v271_v37  ;;  %v618_v37 = vand.u32 65535, %v2562_v27  ;;  %v648_v27 = vand.u32 65535, %v2585_v49 }
  0xd8   :  { %2237 = vpow2.f32 %v269_v29 }
  0xd9   :  { %v2214_v23 = vpop.eup %2213 }
  0xda   :  { %v2216_v44 = vpop.eup %2215  ;;  %v311_v24 = vsel %vm112_vm0, %v2214_v23, 0.0 }
  0xdb   :  { %v2218_v41 = vpop.eup %2217  ;;  %v320_v56 = vsel %vm112_vm0, %v2216_v44, 0.0 }
  0xdc   :  { %v2220_v14 = vpop.eup %2219  ;;  %v317_v11 = vsel %vm112_vm0, %v2218_v41, 0.0  ;;  %v603_v41 = vand.u32 65535, %v2549_v15  ;;  %v633_v15 = vand.u32 65535, %v2582_v48 }
  0xdd   :  { %v2222_v18 = vpop.eup %2221  ;;  %v326_v26 = vsel %vm112_vm0, %v2220_v14, 0.0 }
  0xde   :  { %v2224_v28 = vpop.eup %2223  ;;  %v323_v62 = vsel %vm112_vm0, %v2222_v18, 0.0  ;;  %v605_v14 = vcvt.s32.f32 %v603_v41  ;;  %v3282_v18 = vld [vmem:[#allocation6_spill] sm:$0xff] }
  0xdf   :  { %v2226_v36 = vpop.eup %2225  ;;  %v332_v2 = vsel %vm112_vm0, %v2224_v28, 0.0  ;;  %v635_v28 = vcvt.s32.f32 %v633_v15 }
  0xe0   :  { %v2228_v0 = vpop.eup %2227  ;;  %v329_v34 = vsel %vm112_vm0, %v2226_v36, 0.0 }
  0xe1   :  { %v2230_v5 = vpop.eup %2229  ;;  %v338_v1 = vsel %vm112_vm0, %v2228_v0, 0.0  ;;  %v3285_v0 = vld [vmem:[#allocation9_spill] sm:$0xff] }
  0xe2   :  { %v2232_v35 = vpop.eup %2231  ;;  %v335_v9 = vsel %vm112_vm0, %v2230_v5, 0.0  ;;  %v678_v49 = vand.u32 65535, %v3285_v0  ;;  %v3286_v5 = vld [vmem:[#allocation10_spill] sm:$0xff] }
  0xe3   :  { %v2234_v39 = vpop.eup %2233  ;;  %v344_v8 = vsel %vm112_vm0, %v2232_v35, 0.0 }
  0xe4   :  { %v2236_v40 = vpop.eup %2235  ;;  %v341_v13 = vsel %vm112_vm0, %v2234_v39, 0.0  ;;  %v693_v39 = vand.u32 65535, %v2626_v57 }
  0xe5   :  { %309 = vadd.xlane.f32.xlu1 %v308_v55  ;;  %v2238_v33 = vpop.eup %2237  ;;  %v350_v46 = vsel %vm112_vm0, %v2236_v40, 0.0  ;;  %v513_v55 = vand.u32 65535, %v2488_v45  ;;  %v680_v40 = vcvt.s32.f32 %v678_v49 }
  0xe6   :  { %v347_v12 = vsel %vm112_vm0, %v2238_v33, 0.0  ;;  %v695_v57 = vcvt.s32.f32 %v693_v39 }
  0xe7   :  { %v515_v23 = vcvt.s32.f32 %v513_v55 }
  0xe9   :  { %306 = vadd.xlane.f32.xlu0 %v305_v3  ;;  %315 = vadd.xlane.f32.xlu1 %v314_v25  ;;  %v545_v25 = vcvt.s32.f32 %v543_v38 }
  0xed   :  { %312 = vadd.xlane.f32.xlu0 %v311_v24  ;;  %321 = vadd.xlane.f32.xlu1 %v320_v56  ;;  %v575_v24 = vcvt.s32.f32 %v573_v53 }
  0xf1   :  { %318 = vadd.xlane.f32.xlu0 %v317_v11  ;;  %327 = vadd.xlane.f32.xlu1 %v326_v26 }
  0xf5   :  { %324 = vadd.xlane.f32.xlu0 %v323_v62  ;;  %333 = vadd.xlane.f32.xlu1 %v332_v2  ;;  %v3283_v62 = vld [vmem:[#allocation8_spill] sm:$0xff]  ;;  %v3284_v2 = vld [vmem:[#allocation7_spill] sm:$0xff] }
  0xf6   :  { %v663_v48 = vand.u32 65535, %v3283_v62 }
  0xf9   :  { %330 = vadd.xlane.f32.xlu0 %v329_v34  ;;  %339 = vadd.xlane.f32.xlu1 %v338_v1 }
  0xfd   :  { %336 = vadd.xlane.f32.xlu0 %v335_v9  ;;  %345 = vadd.xlane.f32.xlu1 %v344_v8  ;;  %v665_v9 = vcvt.s32.f32 %v663_v48 }
 0x101   :  { %342 = vadd.xlane.f32.xlu0 %v341_v13  ;;  %351 = vadd.xlane.f32.xlu1 %v350_v46  ;;  %v708_v13 = vand.u32 65535, %v2629_v61 }
 0x103   :  { %v710_v55 = vcvt.s32.f32 %v708_v13 }
 0x105   :  { %348 = vadd.xlane.f32.xlu0 %v347_v12  ;;  %v2327_v12 = vmov 0  }
 0x106   :  { %2115 = vset.pattern.permute.xlu0 %v2327_v12  ;;  %2121 = vset.pattern.permute.xlu1 %v2327_v12 }
 0x11d   :  { %v2704_v54 = vpop.xlane.xlu1 %502 }
 0x11e   :  { %vm504_vm2 = vcmp.eq.f32.partialorder %v2484_v43, %v2704_v54  ;;  %v558_v43 = vand.u32 65535, %v2525_v60 }
 0x11f   :  { %v505_v63 = vsel %vm504_vm2, %v500_v17, inf }
 0x120   :  { %506 = vmin.xlane.f32.xlu0 %v505_v63  ;;  %v3289_v63 = vmov 0.0  }
 0x121   :  { %v2710_v21 = vpop.xlane.xlu0 %517  ;;  %v2712_v3 = vpop.xlane.xlu1 %532 }
 0x122   :  { %vm519_vm0 = vcmp.eq.f32.partialorder %v2502_v51, %v2710_v21  ;;  %vm534_vm3 = vcmp.eq.f32.partialorder %v2504_v52, %v2712_v3  ;;  %v560_v51 = vcvt.s32.f32 %v558_v43  ;;  %v588_v52 = vand.u32 65535, %v2538_v6 }
 0x123   :  { %v520_v42 = vsel %vm519_vm0, %v515_v23, inf  ;;  %v535_v45 = vsel %vm534_vm3, %v530_v20, inf }
 0x124   :  { %521 = vmin.xlane.f32.xlu1 %v520_v42  ;;  %536 = vmin.xlane.f32.xlu0 %v535_v45  ;;  %v590_v4 = vcvt.s32.f32 %v588_v52  ;;  %v3291_v42 = vld [vmem:[#allocation13_spill] sm:$0xff] }
 0x125   :  { %v2720_v19 = vpop.xlane.xlu0 %547  ;;  %v2725_v50 = vpop.xlane.xlu1 %562  ;;  %v723_v45 = vand.u32 65535, %v3291_v42 }
 0x126   :  { %vm549_vm4 = vcmp.eq.f32.partialorder %v2522_v59, %v2720_v19  ;;  %vm564_vm5 = vcmp.eq.f32.partialorder %v2543_v10, %v2725_v50 }
 0x127   :  { %v550_v44 = vsel %vm549_vm4, %v545_v25, inf  ;;  %v565_v32 = vsel %vm564_vm5, %v560_v51, inf  ;;  %v3292_v25 = vld [vmem:[#allocation14_spill] sm:$0xff]  ;;  %v725_v53 = vcvt.s32.f32 %v723_v45 }
 0x128   :  { %551 = vmin.xlane.f32.xlu1 %v550_v44  ;;  %566 = vmin.xlane.f32.xlu0 %v565_v32 }
 0x129   :  { %v2730_v60 = vpop.xlane.xlu0 %577  ;;  %v2733_v59 = vpop.xlane.xlu1 %592 }
 0x12a   :  { %vm579_vm6 = vcmp.eq.f32.partialorder %v2556_v22, %v2730_v60  ;;  %vm594_vm7 = vcmp.eq.f32.partialorder %v2566_v30, %v2733_v59  ;;  %v620_v22 = vcvt.s32.f32 %v618_v37 }
 0x12b   :  { %v580_v56 = vsel %vm579_vm6, %v575_v24, inf  ;;  %v595_v6 = vsel %vm594_vm7, %v590_v4, inf }
 0x12c   :  { %581 = vmin.xlane.f32.xlu1 %v580_v56  ;;  %596 = vmin.xlane.f32.xlu0 %v595_v6 }
 0x12d   :  { %v2740_v10 = vpop.xlane.xlu0 %607  ;;  %v2743_v29 = vpop.xlane.xlu1 %622 }
 0x12e   :  { %vm609_vm8 = vcmp.eq.f32.partialorder %v2569_v31, %v2740_v10  ;;  %vm624_vm9 = vcmp.eq.f32.partialorder %v3282_v18, %v2743_v29  ;;  %v650_v31 = vcvt.s32.f32 %v648_v27 }
 0x12f   :  { %v610_v11 = vsel %vm609_vm8, %v605_v14, inf  ;;  %v625_v30 = vsel %vm624_vm9, %v620_v22, inf }
 0x130   :  { %611 = vmin.xlane.f32.xlu1 %v610_v11  ;;  %626 = vmin.xlane.f32.xlu0 %v625_v30 }
 0x131   :  { %v2750_v26 = vpop.xlane.xlu0 %637  ;;  %v2753_v36 = vpop.xlane.xlu1 %652 }
 0x132   :  { %vm639_vm10 = vcmp.eq.f32.partialorder %v3284_v2, %v2750_v26  ;;  %vm654_vm11 = vcmp.eq.f32.partialorder %v3286_v5, %v2753_v36 }
 0x133   :  { %v640_v34 = vsel %vm639_vm10, %v635_v28, inf  ;;  %v655_v1 = vsel %vm654_vm11, %v650_v31, inf }
 0x134   :  { %641 = vmin.xlane.f32.xlu1 %v640_v34  ;;  %656 = vmin.xlane.f32.xlu0 %v655_v1 }
 0x135   :  { %v2760_v35 = vpop.xlane.xlu0 %667  ;;  %v2763_v8 = vpop.xlane.xlu1 %682 }
 0x136   :  { %vm669_vm12 = vcmp.eq.f32.partialorder %v2623_v58, %v2760_v35  ;;  %vm684_vm13 = vcmp.eq.f32.partialorder %v2631_v7, %v2763_v8  ;;  %v3287_v58 = vld [vmem:[#allocation11_spill] sm:$0xff] }
 0x137   :  { %v670_v33 = vsel %vm669_vm12, %v665_v9, inf  ;;  %v685_v46 = vsel %vm684_vm13, %v680_v40, inf }
 0x138   :  { %671 = vmin.xlane.f32.xlu1 %v670_v33  ;;  %686 = vmin.xlane.f32.xlu0 %v685_v46 }
 0x139   :  { %v2770_v47 = vpop.xlane.xlu0 %697  ;;  %v2772_v17 = vpop.xlane.xlu1 %712 }
 0x13a   :  { %vm699_vm14 = vcmp.eq.f32.partialorder %v3287_v58, %v2770_v47  ;;  %vm714_vm15 = vcmp.eq.f32.partialorder %v3288_v16, %v2772_v17 }
 0x13b   :  { %v700_v61 = vsel %vm699_vm14, %v695_v57, inf  ;;  %v715_v7 = vsel %vm714_vm15, %v710_v55, inf  ;;  %v3293_v57 = vld [vmem:[#allocation5_spill] sm:$0xff] }
 0x13c   :  { %701 = vmin.xlane.f32.xlu1 %v700_v61  ;;  %716 = vmin.xlane.f32.xlu0 %v715_v7 }
 0x13d   :  { %v2786_v23 = vpop.xlane.xlu0 %727  ;;  %v2788_v20 = vpop.permute.xlu1 %2051 }
 0x13e   :  { %3290 = vst [vmem:[#allocation6_spill] sm:$0xff] %v2788_v20  ;;  %vm729_vm1 = vcmp.eq.f32.partialorder %v3292_v25, %v2786_v23 }
 0x13f   :  { %v730_v52 = vsel %vm729_vm1, %v725_v53, inf }
 0x141   :  { %v2790_v38 = vpop.permute.xlu0 %2046 }
 0x14d   :  { %2061 = vrot.lane.b32.xlu1 %v3289_v63, %s2326_s0 }
 0x151   :  { %2071 = vrot.lane.b32.xlu1 %v3289_v63, %s2326_s0 }
 0x152   :  { %2056 = vrot.lane.b32.xlu0 %v3289_v63, %s2326_s0 }
 0x156   :  { %2066 = vrot.lane.b32.xlu0 %v3289_v63, %s2326_s0 }
 0x16e   :  { %v310_v43 = vpop.xlane.xlu1 %309 }
 0x16f   :  { %2239 = vrcp.f32 %v310_v43 }
 0x172   :  { %v307_v44 = vpop.xlane.xlu0 %306  ;;  %v316_v51 = vpop.xlane.xlu1 %315 }
 0x173   :  { %2241 = vrcp.f32 %v307_v44 }
 0x174   :  { %2243 = vrcp.f32 %v316_v51 }
 0x175   :  { %731 = vmin.xlane.f32.xlu1 %v730_v52 }
 0x176   :  { %v313_v32 = vpop.xlane.xlu0 %312  ;;  %v322_v24 = vpop.xlane.xlu1 %321 }
 0x177   :  { %2245 = vrcp.f32 %v313_v32 }
 0x178   :  { %2247 = vrcp.f32 %v322_v24 }
 0x17a   :  { %v319_v41 = vpop.xlane.xlu0 %318  ;;  %v328_v4 = vpop.xlane.xlu1 %327 }
 0x17b   :  { %2249 = vrcp.f32 %v319_v41 }
 0x17c   :  { %2251 = vrcp.f32 %v328_v4  ;;  %v2795_v37 = vpop.eup %2239 }
 0x17d   :  { %v1204_v6 = vmul.f32 15.0, %v2795_v37 }
 0x17e   :  { %v325_v56 = vpop.xlane.xlu0 %324  ;;  %v334_v14 = vpop.xlane.xlu1 %333 }
 0x17f   :  { %2253 = vrcp.f32 %v325_v56  ;;  %v1236_v22 = vceil.f32 %v1204_v6 }
 0x180   :  { %v2798_v15 = vpop.eup %2241  ;;  %2255 = vrcp.f32 %v334_v14 }
 0x181   :  { %v2800_v27 = vpop.eup %2243  ;;  %v1203_v11 = vmul.f32 15.0, %v2798_v15  ;;  %v2010_v30 = vtrunc.f32 %v1236_v22 }
 0x182   :  { %v331_v18 = vpop.xlane.xlu0 %330  ;;  %v1206_v28 = vmul.f32 15.0, %v2800_v27  ;;  %v340_v62 = vpop.xlane.xlu1 %339 }
 0x183   :  { %2257 = vrcp.f32 %v331_v18  ;;  %v1235_v48 = vceil.f32 %v1203_v11  ;;  %v2011_v31 = vcvt.f32.s32 %v2010_v30 }
 0x184   :  { %v2804_v2 = vpop.eup %2245  ;;  %2259 = vrcp.f32 %v340_v62  ;;  %v1238_v0 = vceil.f32 %v1206_v28 }
 0x185   :  { %v2806_v49 = vpop.eup %2247  ;;  %v2008_v34 = vtrunc.f32 %v1235_v48  ;;  %v1205_v5 = vmul.f32 15.0, %v2804_v2  ;;  %v1961_v9 = vadd.s32 4294967295, %v2011_v31 }
 0x186   :  { %v337_v1 = vpop.xlane.xlu0 %336  ;;  %v2014_v39 = vtrunc.f32 %v1238_v0  ;;  %v1208_v40 = vmul.f32 15.0, %v2806_v49  ;;  %v346_v13 = vpop.xlane.xlu1 %345 }
 0x187   :  { %2261 = vrcp.f32 %v337_v1  ;;  %v2009_v33 = vcvt.f32.s32 %v2008_v34  ;;  %v1237_v46 = vceil.f32 %v1205_v5  ;;  %vm1364_vm2 = vcmp.eq.s32.totalorder %v3293_v57, %v1961_v9 }
 0x188   :  { %v2810_v12 = vpop.eup %2249  ;;  %2263 = vrcp.f32 %v346_v13  ;;  %v2015_v58 = vcvt.f32.s32 %v2014_v39  ;;  %v1240_v55 = vceil.f32 %v1208_v40  ;;  %v2817_v43 = vsel %vm1364_vm2, 1.0, %v3289_v63 }
 0x189   :  { %v2813_v61 = vpop.eup %2251  ;;  %v1960_v16 = vadd.s32 4294967295, %v2009_v33  ;;  %v2012_v7 = vtrunc.f32 %v1237_v46  ;;  %v1207_v42 = vmul.f32 15.0, %v2810_v12 }
 0x18a   :  { %v343_v45 = vpop.xlane.xlu0 %342  ;;  %v1963_v25 = vadd.s32 4294967295, %v2015_v58  ;;  %v2018_v44 = vtrunc.f32 %v1240_v55  ;;  %v1210_v53 = vmul.f32 15.0, %v2813_v61  ;;  %v352_v51 = vpop.xlane.xlu1 %351 }
 0x18b   :  { %2265 = vrcp.f32 %v343_v45  ;;  %vm1363_vm0 = vcmp.eq.s32.totalorder %v3293_v57, %v1960_v16  ;;  %v2013_v52 = vcvt.f32.s32 %v2012_v7  ;;  %v1239_v32 = vceil.f32 %v1207_v42 }
 0x18c   :  { %v2821_v24 = vpop.eup %2253  ;;  %2267 = vrcp.f32 %v352_v51  ;;  %v2824_v41 = vsel %vm1363_vm0, 1.0, %v3289_v63  ;;  %vm1366_vm3 = vcmp.eq.s32.totalorder %v3293_v57, %v1963_v25  ;;  %v2019_v4 = vcvt.f32.s32 %v2018_v44 }
 0x18d   :  { %v2827_v56 = vpop.eup %2255  ;;  %v2075_v6 = vpack.i.bf16 %v2817_v43, %v2824_v41  ;;  %v1962_v14 = vadd.s32 4294967295, %v2013_v52  ;;  %v2016_v22 = vtrunc.f32 %v1239_v32  ;;  %v1209_v30 = vmul.f32 15.0, %v2821_v24 }
 0x18e   :  { %v349_v11 = vpop.xlane.xlu0 %348  ;;  %v1965_v18 = vadd.s32 4294967295, %v2019_v4  ;;  %v1242_v28 = vceil.f32 %v1210_v53  ;;  %v1212_v62 = vmul.f32 15.0, %v2827_v56  ;;  %v2836_v48 = vsel %vm1366_vm3, 1.0, %v3289_v63 }
 0x18f   :  { %2269 = vrcp.f32 %v349_v11  ;;  %2076 = vrot.lane.b32.xlu0 %v2075_v6, %s2326_s0  ;;  %vm1365_vm4 = vcmp.eq.s32.totalorder %v3293_v57, %v1962_v14  ;;  %v2017_v31 = vcvt.f32.s32 %v2016_v22  ;;  %v1241_v5 = vceil.f32 %v1209_v30 }
 0x190   :  { %v2838_v0 = vpop.eup %2257  ;;  %v2841_v34 = vsel %vm1365_vm4, 1.0, %v3289_v63  ;;  %vm1368_vm5 = vcmp.eq.s32.totalorder %v3293_v57, %v1965_v18  ;;  %v2022_v1 = vtrunc.f32 %v1242_v28  ;;  %v1244_v58 = vceil.f32 %v1212_v62 }
 0x191   :  { %v2844_v9 = vpop.eup %2259  ;;  %v2080_v39 = vpack.i.bf16 %v2836_v48, %v2841_v34  ;;  %v1964_v40 = vadd.s32 4294967295, %v2017_v31  ;;  %v1211_v13 = vmul.f32 15.0, %v2838_v0  ;;  %v2020_v33 = vtrunc.f32 %v1241_v5 }
 0x192   :  { %v2023_v46 = vcvt.f32.s32 %v2022_v1  ;;  %v1214_v55 = vmul.f32 15.0, %v2844_v9  ;;  %v2853_v16 = vsel %vm1368_vm5, 1.0, %v3289_v63  ;;  %v2026_v53 = vtrunc.f32 %v1244_v58 }
 0x193   :  { %2081 = vrot.lane.b32.xlu1 %v2080_v39, %s2326_s0  ;;  %vm1367_vm6 = vcmp.eq.s32.totalorder %v3293_v57, %v1964_v40  ;;  %v1243_v7 = vceil.f32 %v1211_v13  ;;  %v2021_v25 = vcvt.f32.s32 %v2020_v33 }
 0x194   :  { %v2855_v42 = vpop.eup %2261  ;;  %v2858_v45 = vsel %vm1367_vm6, 1.0, %v3289_v63  ;;  %v1967_v44 = vadd.s32 4294967295, %v2023_v46  ;;  %v1246_v6 = vceil.f32 %v1214_v55  ;;  %v2027_v22 = vcvt.f32.s32 %v2026_v53 }
 0x195   :  { %v2860_v51 = vpop.eup %2263  ;;  %v2085_v52 = vpack.i.bf16 %v2853_v16, %v2858_v45  ;;  %v2024_v32 = vtrunc.f32 %v1243_v7  ;;  %v1213_v4 = vmul.f32 15.0, %v2855_v42  ;;  %v1966_v14 = vadd.s32 4294967295, %v2021_v25 }
 0x196   :  { %vm1370_vm7 = vcmp.eq.s32.totalorder %v3293_v57, %v1967_v44  ;;  %v1216_v11 = vmul.f32 15.0, %v2860_v51  ;;  %v2030_v28 = vtrunc.f32 %v1246_v6  ;;  %v1969_v5 = vadd.s32 4294967295, %v2027_v22 }
 0x197   :  { %2086 = vrot.lane.b32.xlu1 %v2085_v52, %s2326_s0  ;;  %v2025_v18 = vcvt.f32.s32 %v2024_v32  ;;  %v1245_v30 = vceil.f32 %v1213_v4  ;;  %vm1369_vm8 = vcmp.eq.s32.totalorder %v3293_v57, %v1966_v14  ;;  %v2872_v31 = vsel %vm1370_vm7, 1.0, %v3289_v63 }
 0x198   :  { %v2868_v62 = vpop.eup %2265  ;;  %v1248_v1 = vceil.f32 %v1216_v11  ;;  %v2877_v40 = vsel %vm1369_vm8, 1.0, %v3289_v63  ;;  %v2031_v46 = vcvt.f32.s32 %v2030_v28  ;;  %vm1372_vm9 = vcmp.eq.s32.totalorder %v3293_v57, %v1969_v5 }
 0x199   :  { %v2874_v39 = vpop.eup %2267  ;;  %v1968_v13 = vadd.s32 4294967295, %v2025_v18  ;;  %v2028_v33 = vtrunc.f32 %v1245_v30  ;;  %v2090_v58 = vpack.i.bf16 %v2872_v31, %v2877_v40  ;;  %v1215_v55 = vmul.f32 15.0, %v2868_v62 }
 0x19a   :  { %v2034_v7 = vtrunc.f32 %v1248_v1  ;;  %v2885_v25 = vsel %vm1372_vm9, 1.0, %v3289_v63  ;;  %v1971_v53 = vadd.s32 4294967295, %v2031_v46  ;;  %v1218_v14 = vmul.f32 15.0, %v2874_v39 }
 0x19b   :  { %vm1371_vm10 = vcmp.eq.s32.totalorder %v3293_v57, %v1968_v13  ;;  %v2029_v44 = vcvt.f32.s32 %v2028_v33  ;;  %2091 = vrot.lane.b32.xlu1 %v2090_v58, %s2326_s0  ;;  %v1247_v4 = vceil.f32 %v1215_v55 }
 0x19c   :  { %v2887_v52 = vpop.eup %2269  ;;  %v2891_v32 = vsel %vm1371_vm10, 1.0, %v3289_v63  ;;  %v2035_v6 = vcvt.f32.s32 %v2034_v7  ;;  %vm1374_vm11 = vcmp.eq.s32.totalorder %v3293_v57, %v1971_v53  ;;  %v1250_v5 = vceil.f32 %v1218_v14 }
 0x19d   :  { %v2095_v22 = vpack.i.bf16 %v2885_v25, %v2891_v32  ;;  %v1970_v11 = vadd.s32 4294967295, %v2029_v44  ;;  %v1217_v18 = vmul.f32 15.0, %v2887_v52  ;;  %v2032_v30 = vtrunc.f32 %v1247_v4 }
 0x19e   :  { %v1973_v28 = vadd.s32 4294967295, %v2035_v6  ;;  %v2904_v33 = vsel %vm1374_vm11, 1.0, %v3289_v63  ;;  %v2038_v58 = vtrunc.f32 %v1250_v5  ;;  %v509_v4 = vcvt.f32.s32 %v2704_v54 }
 0x19f   :  { %2096 = vrot.lane.b32.xlu0 %v2095_v22, %s2326_s0  ;;  %vm1373_vm12 = vcmp.eq.s32.totalorder %v3293_v57, %v1970_v11  ;;  %v1249_v1 = vceil.f32 %v1217_v18  ;;  %v2033_v46 = vcvt.f32.s32 %v2032_v30  ;;  %v524_v54 = vcvt.f32.s32 %v2710_v21  ;;  %v80_v21 = vld [vmem:[%s3256_s1] sm:$0xff] }
 0x1a0   :  { %v2901_v13 = vsel %vm1373_vm12, 1.0, %v3289_v63  ;;  %vm1376_vm13 = vcmp.eq.s32.totalorder %v3293_v57, %v1973_v28  ;;  %v2039_v53 = vcvt.f32.s32 %v2038_v58  ;;  %v510_v28 = vshll.u32 %v509_v4, 16 }
 0x1a1   :  { %v2100_v55 = vpack.i.bf16 %v2904_v33, %v2901_v13  ;;  %v2036_v7 = vtrunc.f32 %v1249_v1  ;;  %v1972_v44 = vadd.s32 4294967295, %v2033_v46  ;;  %v2916_v11 = vsel %vm1376_vm13, 1.0, %v3289_v63 }
 0x1a2   :  { %v1975_v14 = vadd.s32 4294967295, %v2039_v53  ;;  %v539_v1 = vcvt.f32.s32 %v2712_v3  ;;  %v525_v53 = vshll.u32 %v524_v54, 16 }
 0x1a3   :  { %2101 = vrot.lane.b32.xlu1 %v2100_v55, %s2326_s0  ;;  %v2037_v6 = vcvt.f32.s32 %v2036_v7  ;;  %vm1375_vm14 = vcmp.eq.s32.totalorder %v3293_v57, %v1972_v44 }
 0x1a4   :  { %v2913_v22 = vsel %vm1375_vm14, 1.0, %v3289_v63  ;;  %vm1378_vm15 = vcmp.eq.s32.totalorder %v3293_v57, %v1975_v14  ;;  %v540_v4 = vshll.u32 %v539_v1, 16 }
 0x1a5   :  { %v1974_v18 = vadd.s32 4294967295, %v2037_v6  ;;  %v2105_v30 = vpack.i.bf16 %v2916_v11, %v2913_v22  ;;  %v2929_v55 = vsel %vm1378_vm15, 1.0, %v3289_v63  ;;  %v554_v6 = vcvt.f32.s32 %v2720_v19  ;;  %v83_v19 = vld [vmem:[%s3256_s1 + $0x18] sm:$0xff] }
 0x1a7   :  { %vm1377_vm1 = vcmp.eq.s32.totalorder %v3293_v57, %v1974_v18  ;;  %2106 = vrot.lane.b32.xlu0 %v2105_v30, %s2326_s0  ;;  %v81_v30 = vld [vmem:[%s3256_s1 + $0x8] sm:$0xff]  ;;  %v555_v20 = vshll.u32 %v554_v6, 16 }
 0x1a8   :  { %v2926_v58 = vsel %vm1377_vm1, 1.0, %v3289_v63 }
 0x1a9   :  { %v507_v5 = vpop.xlane.xlu0 %506  ;;  %v2110_v7 = vpack.i.bf16 %v2929_v55, %v2926_v58 }
 0x1aa   :  { %v508_v46 = vcvt.f32.s32 %v507_v5  ;;  %v569_v5 = vcvt.f32.s32 %v2725_v50 }
 0x1ab   :  { %2111 = vrot.lane.b32.xlu1 %v2110_v7, %s2326_s0 }
 0x1ac   :  { %v511_v44 = vadd.s32 %v510_v28, %v508_v46  ;;  %v82_v46 = vld [vmem:[%s3256_s1 + $0x10] sm:$0xff] }
 0x1ad   :  { %v522_v3 = vpop.xlane.xlu1 %521  ;;  %v537_v57 = vpop.xlane.xlu0 %536 }
 0x1ae   :  { %v523_v14 = vcvt.f32.s32 %v522_v3  ;;  %v538_v18 = vcvt.f32.s32 %v537_v57  ;;  %vm977_vm2 = vcmp.eq.s32.totalorder %v511_v44, %v80_v21 }
 0x1af   :  { %v1928_v3 = vsel %vm977_vm2, 1.0, %v3289_v63 }
 0x1b0   :  { %v526_v28 = vadd.s32 %v525_v53, %v523_v14  ;;  %v541_v54 = vadd.s32 %v540_v4, %v538_v18  ;;  %v584_v53 = vcvt.f32.s32 %v2730_v60  ;;  %v570_v4 = vshll.u32 %v569_v5, 16  ;;  %v84_v18 = vld [vmem:[%s3256_s1 + $0x20] sm:$0xff] }
 0x1b1   :  { %v552_v7 = vpop.xlane.xlu1 %551  ;;  %v567_v21 = vpop.xlane.xlu0 %566  ;;  %v599_v14 = vcvt.f32.s32 %v2733_v59 }
 0x1b2   :  { %vm978_vm0 = vcmp.eq.s32.totalorder %v526_v28, %v81_v30  ;;  %v553_v1 = vcvt.f32.s32 %v552_v7  ;;  %vm979_vm3 = vcmp.eq.s32.totalorder %v541_v54, %v82_v46  ;;  %v568_v6 = vcvt.f32.s32 %v567_v21 }
 0x1b3   :  { %v1929_v44 = vsel %vm978_vm0, 1.0, %v3289_v63  ;;  %v1930_v7 = vsel %vm979_vm3, 1.0, %v3289_v63  ;;  %v585_v54 = vshll.u32 %v584_v53, 16  ;;  %v600_v59 = vshll.u32 %v599_v14, 16 }
 0x1b4   :  { %v556_v50 = vadd.s32 %v555_v20, %v553_v1  ;;  %v2116_v57 = vpack.i.bf16 %v1929_v44, %v1928_v3  ;;  %v571_v30 = vadd.s32 %v570_v4, %v568_v6  ;;  %v614_v20 = vcvt.f32.s32 %v2740_v10  ;;  %v85_v3 = vld [vmem:[%s3256_s1 + $0x28] sm:$0xff]  ;;  %v86_v10 = vld [vmem:[%s3256_s1 + $0x30] sm:$0xff] }
 0x1b5   :  { %v582_v28 = vpop.xlane.xlu1 %581  ;;  %v597_v5 = vpop.xlane.xlu0 %596  ;;  %v644_v21 = vcvt.f32.s32 %v2750_v26  ;;  %v659_v14 = vcvt.f32.s32 %v2753_v36  ;;  %v88_v36 = vld [vmem:[%s3256_s1 + $0x40] sm:$0xff] }
 0x1b6   :  { %vm980_vm4 = vcmp.eq.s32.totalorder %v556_v50, %v83_v19  ;;  %2117 = vperm.xlu0 %2115, %v2116_v57   ;;  %v583_v46 = vcvt.f32.s32 %v582_v28  ;;  %v629_v19 = vcvt.f32.s32 %v2743_v29  ;;  %v598_v44 = vcvt.f32.s32 %v597_v5 }
 0x1b7   :  { %v1931_v60 = vsel %vm980_vm4, 1.0, %v3289_v63  ;;  %vm981_vm5 = vcmp.eq.s32.totalorder %v571_v30, %v84_v18  ;;  %v615_v4 = vshll.u32 %v614_v20, 16  ;;  %v87_v18 = vld [vmem:[%s3256_s1 + $0x38] sm:$0xff] }
 0x1b8   :  { %v2122_v1 = vpack.i.bf16 %v1931_v60, %v1930_v7  ;;  %v586_v50 = vadd.s32 %v585_v54, %v583_v46  ;;  %v601_v53 = vadd.s32 %v600_v59, %v598_v44  ;;  %v630_v28 = vshll.u32 %v629_v19, 16 }
 0x1b9   :  { %v612_v57 = vpop.xlane.xlu1 %611  ;;  %v627_v6 = vpop.xlane.xlu0 %626  ;;  %v1932_v26 = vsel %vm981_vm5, 1.0, %v3289_v63  ;;  %v645_v46 = vshll.u32 %v644_v21, 16  ;;  %v674_v59 = vcvt.f32.s32 %v2760_v35  ;;  %v689_v44 = vcvt.f32.s32 %v2763_v8  ;;  %v90_v35 = vld [vmem:[%s3256_s1 + $0x50] sm:$0xff] }
 0x1ba   :  { %2123 = vperm.xlu1 %2121, %v2122_v1   ;;  %vm982_vm6 = vcmp.eq.s32.totalorder %v586_v50, %v85_v3  ;;  %v613_v29 = vcvt.f32.s32 %v612_v57  ;;  %v628_v30 = vcvt.f32.s32 %v627_v6  ;;  %vm983_vm7 = vcmp.eq.s32.totalorder %v601_v53, %v86_v10  ;;  %v89_v50 = vld [vmem:[%s3256_s1 + $0x48] sm:$0xff]  ;;  %v91_v53 = vld [vmem:[%s3256_s1 + $0x58] sm:$0xff] }
 0x1bb   :  { %v1933_v7 = vsel %vm982_vm6, 1.0, %v3289_v63  ;;  %v660_v1 = vshll.u32 %v659_v14, 16  ;;  %v1934_v57 = vsel %vm983_vm7, 1.0, %v3289_v63  ;;  %v675_v8 = vshll.u32 %v674_v59, 16 }
 0x1bc   :  { %v616_v60 = vadd.s32 %v615_v4, %v613_v29  ;;  %v2127_v54 = vpack.i.bf16 %v1933_v7, %v1932_v26  ;;  %v631_v20 = vadd.s32 %v630_v28, %v628_v30  ;;  %v690_v10 = vshll.u32 %v689_v44, 16 }
 0x1bd   :  { %v642_v5 = vpop.xlane.xlu1 %641  ;;  %v657_v3 = vpop.xlane.xlu0 %656 }
 0x1be   :  { %vm984_vm8 = vcmp.eq.s32.totalorder %v616_v60, %v87_v18  ;;  %v643_v19 = vcvt.f32.s32 %v642_v5  ;;  %2128 = vperm.xlu1 %2121, %v2127_v54   ;;  %v658_v21 = vcvt.f32.s32 %v657_v3  ;;  %vm985_vm9 = vcmp.eq.s32.totalorder %v631_v20, %v88_v36 }
 0x1bf   :  { %v1935_v4 = vsel %vm984_vm8, 1.0, %v3289_v63  ;;  %v704_v18 = vcvt.f32.s32 %v2770_v47  ;;  %v1936_v60 = vsel %vm985_vm9, 1.0, %v3289_v63  ;;  %v92_v47 = vld [vmem:[%s3256_s1 + $0x60] sm:$0xff] }
 0x1c0   :  { %v646_v14 = vadd.s32 %v645_v46, %v643_v19  ;;  %v2132_v29 = vpack.i.bf16 %v1935_v4, %v1934_v57  ;;  %v661_v6 = vadd.s32 %v660_v1, %v658_v21  ;;  %v93_v19 = vld [vmem:[%s3256_s1 + $0x68] sm:$0xff] }
 0x1c1   :  { %v672_v28 = vpop.xlane.xlu1 %671  ;;  %v687_v26 = vpop.xlane.xlu0 %686  ;;  %v705_v1 = vshll.u32 %v704_v18, 16 }
 0x1c2   :  { %vm986_vm10 = vcmp.eq.s32.totalorder %v646_v14, %v89_v50  ;;  %v673_v30 = vcvt.f32.s32 %v672_v28  ;;  %2133 = vperm.xlu0 %2115, %v2132_v29   ;;  %v688_v7 = vcvt.f32.s32 %v687_v26  ;;  %vm987_vm11 = vcmp.eq.s32.totalorder %v661_v6, %v90_v35 }
 0x1c3   :  { %v1937_v54 = vsel %vm986_vm10, 1.0, %v3289_v63  ;;  %v1938_v3 = vsel %vm987_vm11, 1.0, %v3289_v63  ;;  %v719_v28 = vcvt.f32.s32 %v2772_v17  ;;  %v734_v26 = vcvt.f32.s32 %v2786_v23  ;;  %v95_v17 = vld [vmem:[%s3256_s1 + $0x78] sm:$0xff] }
 0x1c4   :  { %v676_v46 = vadd.s32 %v675_v8, %v673_v30  ;;  %v2137_v36 = vpack.i.bf16 %v1937_v54, %v1936_v60  ;;  %v691_v20 = vadd.s32 %v690_v10, %v688_v7  ;;  %v94_v7 = vld [vmem:[%s3256_s1 + $0x70] sm:$0xff]  ;;  %v3026_v23 = vmul.f32 %v2795_v37, %v2817_v43  ;;  %s2328_s1 = smov 64  }
 0x1c5   :  { %v702_v5 = vpop.xlane.xlu1 %701  ;;  %v717_v29 = vpop.xlane.xlu0 %716  ;;  %v720_v30 = vshll.u32 %v719_v28, 16  ;;  %v735_v54 = vshll.u32 %v734_v26, 16  ;;  %v3042_v37 = vmul.f32 %v2800_v27, %v2836_v48  ;;  %v3060_v27 = vmul.f32 %v2810_v12, %v2858_v45 }
 0x1c6   :  { %vm988_vm12 = vcmp.eq.s32.totalorder %v676_v46, %v91_v53  ;;  %v703_v59 = vcvt.f32.s32 %v702_v5  ;;  %2138 = vperm.xlu1 %2121, %v2137_v36   ;;  %vm989_vm13 = vcmp.eq.s32.totalorder %v691_v20, %v92_v47  ;;  %v718_v8 = vcvt.f32.s32 %v717_v29 }
 0x1c7   :  { %v1939_v44 = vsel %vm988_vm12, 1.0, %v3289_v63  ;;  %v1940_v57 = vsel %vm989_vm13, 1.0, %v3289_v63  ;;  %v3030_v20 = vmul.f32 %v2798_v15, %v2824_v41  ;;  %v3046_v15 = vmul.f32 %v2804_v2, %v2841_v34 }
 0x1c8   :  { %v706_v50 = vadd.s32 %v705_v1, %v703_v59  ;;  %v2142_v21 = vpack.i.bf16 %v1939_v44, %v1938_v3  ;;  %v721_v53 = vadd.s32 %v720_v30, %v718_v8  ;;  %v3076_v12 = vmul.f32 %v2821_v24, %v2877_v40 }
 0x1c9   :  { %v3006_v35 = vpop.permute.xlu1 %2061  ;;  %v3008_v6 = vpop.permute.xlu0 %2056  ;;  %v3086_v26 = vmul.f32 %v2827_v56, %v2885_v25  ;;  %v3105_v56 = vmul.f32 %v2855_v42, %v2901_v13 }
 0x1ca   :  { %vm990_vm14 = vcmp.eq.s32.totalorder %v706_v50, %v93_v19  ;;  %2143 = vperm.xlu0 %2115, %v2142_v21   ;;  %vm991_vm15 = vcmp.eq.s32.totalorder %v721_v53, %v94_v7 }
 0x1cb   :  { %v1941_v4 = vsel %vm990_vm14, 1.0, %v3289_v63  ;;  %v1942_v5 = vsel %vm991_vm15, 1.0, %v3289_v63 }
 0x1cc   :  { %v2147_v14 = vpack.i.bf16 %v1941_v4, %v1940_v57  ;;  %v3056_v4 = vmul.f32 %v2806_v49, %v2853_v16  ;;  %v3072_v49 = vmul.f32 %v2813_v61, %v2872_v31  ;;  %v3090_v61 = vmul.f32 %v2838_v0, %v2891_v32 }
 0x1cd   :  { %v3011_v18 = vpop.permute.xlu1 %2071  ;;  %v3014_v10 = vpop.permute.xlu0 %2066 }
 0x1ce   :  { %2148 = vperm.xlu1 %2121, %v2147_v14  }
 0x1d2   :  { %2158 = vperm.xlu1 %2121, %v3289_v63  }
 0x1d6   :  { %2168 = vperm.xlu1 %2121, %v3289_v63  }
 0x1da   :  { %2178 = vperm.xlu1 %2121, %v3289_v63  }
 0x1de   :  { %2188 = vperm.xlu1 %2121, %v3289_v63  }
 0x1fe   :  { %v732_v60 = vpop.xlane.xlu1 %731 }
 0x1ff   :  { %v733_v46 = vcvt.f32.s32 %v732_v60  ;;  %v3101_v60 = vmul.f32 %v2844_v9, %v2904_v33  ;;  %v3120_v9 = vmul.f32 %v2868_v62, %v2913_v22 }
 0x201   :  { %v736_v36 = vadd.s32 %v735_v54, %v733_v46  ;;  %v3022_v47 = vpop.permute.xlu0 %2076 }
 0x202   :  { %v2271_v59 = vadd.high.f32.bf16 %v3026_v23, %v3022_v47 }
 0x203   :  { %vm992_vm1 = vcmp.eq.s32.totalorder %v736_v36, %v95_v17  ;;  %v3116_v17 = vmul.f32 %v2860_v51, %v2916_v11  ;;  %v3134_v51 = vmul.f32 %v2887_v52, %v2926_v58 }
 0x204   :  { %v1943_v1 = vsel %vm992_vm1, 1.0, %v3289_v63 }
 0x205   :  { %v3038_v3 = vpop.permute.xlu1 %2081  ;;  %v2152_v44 = vpack.i.bf16 %v1943_v1, %v1942_v5  ;;  %v3130_v1 = vmul.f32 %v2874_v39, %v2929_v55 }
 0x207   :  { %2153 = vperm.xlu0 %2115, %v2152_v44  }
 0x209   :  { %v3052_v57 = vpop.permute.xlu1 %2086 }
 0x20a   :  { %v3297_v23 = vadd.low.f32.bf16 %v3060_v27, %v3052_v57 }
 0x20b   :  { %2163 = vperm.xlu0 %2115, %v3289_v63  }
 0x20d   :  { %v3067_v29 = vpop.permute.xlu1 %2091 }
 0x20f   :  { %2173 = vperm.xlu0 %2115, %v3289_v63  }
 0x211   :  { %v3078_v28 = vpop.permute.xlu0 %2096 }
 0x213   :  { %2183 = vperm.xlu0 %2115, %v3289_v63  }
 0x215   :  { %v3097_v7 = vpop.permute.xlu1 %2101 }
 0x217   :  { %2193 = vperm.xlu0 %2115, %v3289_v63  }
 0x219   :  { %v3112_v46 = vpop.permute.xlu0 %2106 }
 0x21d   :  { %v3122_v42 = vpop.permute.xlu1 %2111 }
 0x231   :  { %v2118_v53 = vpop.permute.xlu0 %2117 }
 0x232   :  { %v2120_v39 = vunpack.i.h.bf16 %v2118_v53  ;;  %v2119_v2 = vunpack.i.l.bf16 %v2118_v53 }
 0x234   :  { %v1748_v52 = vmul.f32 %v2120_v39, %v2817_v43  ;;  %v1747_v62 = vmul.f32 %v2119_v2, %v2824_v41 }
 0x235   :  { %v2124_v0 = vpop.permute.xlu1 %2123 }
 0x236   :  { %v2126_v44 = vunpack.i.h.bf16 %v2124_v0  ;;  %v2125_v21 = vunpack.i.l.bf16 %v2124_v0 }
 0x239   :  { %v2129_v54 = vpop.permute.xlu1 %2128 }
 0x23a   :  { %v2130_v53 = vunpack.i.l.bf16 %v2129_v54 }
 0x23c   :  { %v1751_v41 = vmul.f32 %v2130_v53, %v2858_v45 }
 0x23d   :  { %v2134_v19 = vpop.permute.xlu0 %2133 }
 0x23e   :  { %v2135_v2 = vunpack.i.l.bf16 %v2134_v19 }
 0x241   :  { %v2139_v36 = vpop.permute.xlu1 %2138 }
 0x245   :  { %v2144_v0 = vpop.permute.xlu0 %2143 }
 0x249   :  { %v2149_v24 = vpop.permute.xlu1 %2148 }
 0x24d   :  { %v2159_v5 = vpop.permute.xlu1 %2158 }
 0x24e   :  { %v2161_v8 = vunpack.i.h.bf16 %v2159_v5  ;;  %v2160_v30 = vunpack.i.l.bf16 %v2159_v5  ;;  %v1750_v5 = vmul.f32 %v2126_v44, %v2836_v48 }
 0x250   :  { %v1764_v14 = vmul.f32 0.0, %v2161_v8  ;;  %v1763_v50 = vmul.f32 0.0, %v2160_v30  ;;  %v1749_v8 = vmul.f32 %v2125_v21, %v2841_v34  ;;  %v2131_v30 = vunpack.i.h.bf16 %v2129_v54 }
 0x251   :  { %v1753_v34 = vmul.f32 %v2135_v2, %v2877_v40  ;;  %v2141_v21 = vunpack.i.h.bf16 %v2139_v36  ;;  %v2145_v54 = vunpack.i.l.bf16 %v2144_v0 }
 0x252   :  { %1811 = vrot.lane.b32.xlu1 %v1763_v50, %s2328_s1  ;;  %1813 = vrot.lane.b32.xlu0 %v1764_v14, %s2328_s1  ;;  %v1752_v43 = vmul.f32 %v2131_v30, %v2853_v16  ;;  %v2136_v50 = vunpack.i.h.bf16 %v2134_v19  ;;  %v2140_v14 = vunpack.i.l.bf16 %v2139_v36  ;;  %v2146_v19 = vunpack.i.h.bf16 %v2144_v0 }
 0x253   :  { %v1756_v16 = vmul.f32 %v2141_v21, %v2885_v25  ;;  %v1757_v40 = vmul.f32 %v2145_v54, %v2901_v13  ;;  %v2151_v36 = vunpack.i.h.bf16 %v2149_v24 }
 0x254   :  { %v1754_v48 = vmul.f32 %v2136_v50, %v2872_v31  ;;  %v1755_v45 = vmul.f32 %v2140_v14, %v2891_v32  ;;  %v1758_v31 = vmul.f32 %v2146_v19, %v2904_v33 }
 0x255   :  { %v1760_v25 = vmul.f32 %v2151_v36, %v2916_v11 }
 0x256   :  { %1781 = vrot.lane.b32.xlu0 %v1748_v52, %s2328_s1  ;;  %1779 = vrot.lane.b32.xlu1 %v1747_v62, %s2328_s1  ;;  %v2150_v62 = vunpack.i.l.bf16 %v2149_v24  ;;  %v2169_v24 = vpop.permute.xlu1 %2168 }
 0x257   :  { %v2170_v11 = vunpack.i.l.bf16 %v2169_v24 }
 0x258   :  { %v1759_v32 = vmul.f32 %v2150_v62, %v2913_v22  ;;  %v2171_v22 = vunpack.i.h.bf16 %v2169_v24 }
 0x259   :  { %v1767_v50 = vmul.f32 0.0, %v2170_v11 }
 0x25a   :  { %1785 = vrot.lane.b32.xlu0 %v1750_v5, %s2328_s1  ;;  %1783 = vrot.lane.b32.xlu1 %v1749_v8, %s2328_s1 }
 0x25e   :  { %1789 = vrot.lane.b32.xlu0 %v1752_v43, %s2328_s1  ;;  %1787 = vrot.lane.b32.xlu1 %v1751_v41, %s2328_s1 }
 0x262   :  { %1793 = vrot.lane.b32.xlu0 %v1754_v48, %s2328_s1  ;;  %1791 = vrot.lane.b32.xlu1 %v1753_v34, %s2328_s1  ;;  %v2179_v48 = vpop.permute.xlu1 %2178 }
 0x263   :  { %v2181_v34 = vunpack.i.h.bf16 %v2179_v48  ;;  %v2180_v21 = vunpack.i.l.bf16 %v2179_v48  ;;  %v3296_v48 = vadd.high.f32.bf16 %v3042_v37, %v3038_v3 }
 0x265   :  { %v1771_v19 = vmul.f32 0.0, %v2180_v21 }
 0x266   :  { %1797 = vrot.lane.b32.xlu0 %v1756_v16, %s2328_s1  ;;  %1795 = vrot.lane.b32.xlu1 %v1755_v45, %s2328_s1  ;;  %v1772_v45 = vmul.f32 0.0, %v2181_v34 }
 0x26a   :  { %1801 = vrot.lane.b32.xlu0 %v1758_v31, %s2328_s1  ;;  %1799 = vrot.lane.b32.xlu1 %v1757_v40, %s2328_s1  ;;  %v2189_v40 = vpop.permute.xlu1 %2188 }
 0x26b   :  { %v2190_v36 = vunpack.i.l.bf16 %v2189_v40 }
 0x26e   :  { %1805 = vrot.lane.b32.xlu0 %v1760_v25, %s2328_s1  ;;  %1803 = vrot.lane.b32.xlu1 %v1759_v32, %s2328_s1  ;;  %v2191_v32 = vunpack.i.h.bf16 %v2189_v40 }
 0x282   :  { %v2154_v44 = vpop.permute.xlu0 %2153 }
 0x283   :  { %v2156_v39 = vunpack.i.h.bf16 %v2154_v44  ;;  %v2155_v52 = vunpack.i.l.bf16 %v2154_v44  ;;  %v1775_v44 = vmul.f32 0.0, %v2190_v36 }
 0x285   :  { %v1762_v33 = vmul.f32 %v2156_v39, %v2929_v55  ;;  %v1761_v13 = vmul.f32 %v2155_v52, %v2926_v58  ;;  %v1768_v55 = vmul.f32 0.0, %v2171_v22  ;;  %v1776_v52 = vmul.f32 0.0, %v2191_v32 }
 0x286   :  { %v2164_v5 = vpop.permute.xlu0 %2163  ;;  %v3302_v32 = vadd.high.f32.bf16 %v3086_v26, %v3078_v28 }
 0x287   :  { %v2166_v8 = vunpack.i.h.bf16 %v2164_v5  ;;  %v2165_v30 = vunpack.i.l.bf16 %v2164_v5  ;;  %1809 = vrot.lane.b32.xlu0 %v1762_v33, %s2328_s1  ;;  %1807 = vrot.lane.b32.xlu1 %v1761_v13, %s2328_s1 }
 0x289   :  { %v1766_v53 = vmul.f32 0.0, %v2166_v8  ;;  %v1765_v43 = vmul.f32 0.0, %v2165_v30 }
 0x28a   :  { %v2174_v41 = vpop.permute.xlu0 %2173 }
 0x28b   :  { %1817 = vrot.lane.b32.xlu0 %v1766_v53, %s2328_s1  ;;  %1815 = vrot.lane.b32.xlu1 %v1765_v43, %s2328_s1  ;;  %v2176_v58 = vunpack.i.h.bf16 %v2174_v41  ;;  %v2175_v2 = vunpack.i.l.bf16 %v2174_v41  ;;  %v3294_v43 = vadd.low.f32.bf16 %v3030_v20, %v3022_v47  ;;  %v3298_v20 = vadd.high.f32.bf16 %v3056_v4, %v3052_v57 }
 0x28d   :  { %v1770_v14 = vmul.f32 0.0, %v2176_v58  ;;  %v1769_v0 = vmul.f32 0.0, %v2175_v2  ;;  %v3295_v58 = vadd.low.f32.bf16 %v3046_v15, %v3038_v3 }
 0x28e   :  { %v2184_v16 = vpop.permute.xlu0 %2183 }
 0x28f   :  { %1821 = vrot.lane.b32.xlu0 %v1768_v55, %s2328_s1  ;;  %1819 = vrot.lane.b32.xlu1 %v1767_v50, %s2328_s1  ;;  %v2186_v54 = vunpack.i.h.bf16 %v2184_v16  ;;  %v2185_v31 = vunpack.i.l.bf16 %v2184_v16 }
 0x291   :  { %v1774_v62 = vmul.f32 0.0, %v2186_v54  ;;  %v1773_v25 = vmul.f32 0.0, %v2185_v31  ;;  %v3299_v54 = vadd.low.f32.bf16 %v3076_v12, %v3067_v29  ;;  %v3300_v31 = vadd.high.f32.bf16 %v3072_v49, %v3067_v29 }
 0x292   :  { %v2194_v39 = vpop.permute.xlu0 %2193 }
 0x293   :  { %1825 = vrot.lane.b32.xlu0 %v1770_v14, %s2328_s1  ;;  %1823 = vrot.lane.b32.xlu1 %v1769_v0, %s2328_s1  ;;  %v2196_v33 = vunpack.i.h.bf16 %v2194_v39  ;;  %v2195_v13 = vunpack.i.l.bf16 %v2194_v39 }
 0x295   :  { %v1778_v24 = vmul.f32 0.0, %v2196_v33  ;;  %v1777_v5 = vmul.f32 0.0, %v2195_v13  ;;  %v3303_v33 = vadd.low.f32.bf16 %v3105_v56, %v3097_v7  ;;  %v3304_v13 = vadd.high.f32.bf16 %v3101_v60, %v3097_v7 }
 0x296   :  { %v3307_v7 = vadd.low.f32.bf16 %v3134_v51, %v3122_v42 }
 0x297   :  { %1829 = vrot.lane.b32.xlu0 %v1772_v45, %s2328_s1  ;;  %1827 = vrot.lane.b32.xlu1 %v1771_v19, %s2328_s1 }
 0x29b   :  { %1833 = vrot.lane.b32.xlu0 %v1774_v62, %s2328_s1  ;;  %1831 = vrot.lane.b32.xlu1 %v1773_v25, %s2328_s1  ;;  %v3301_v25 = vadd.low.f32.bf16 %v3090_v61, %v3078_v28 }
 0x29f   :  { %1835 = vrot.lane.b32.xlu0 %v1775_v44, %s2328_s1  ;;  %2198 = vrot.lane.b32.xlu1 %v3289_v63, %s2326_s0 }
 0x2a3   :  { %2203 = vrot.lane.b32.xlu0 %v3289_v63, %s2326_s0  ;;  %1837 = vrot.lane.b32.xlu1 %v1776_v52, %s2328_s1  ;;  %s2329_s0 = smov [#allocation2]  }
 0x2a4   :  { %s1920_s17 = sshll.u32 %s2329_s0, 4  ;;  %s1921_s17 = int_to_ptr.vmem [resolvable:$true] %s1920_s17 }
 0x2a5   :  { %s2303_s18 = scalar_lea.vmem %s1921_s17, 16  ;;  %s2307_s19 = scalar_lea.vmem %s1921_s17, 32 }
 0x2a6   :  { %p2304_p0 = scmp.ne.s32.totalorder %s1921_s17, %s2303_s18  ;;  %p2308_p1 = scmp.lt.s32.totalorder %s1921_s17, %s1921_s17 }
 0x2a7   :  { %1841 = vrot.lane.b32.xlu0 %v1778_v24, %s2328_s1  ;;  %1839 = vrot.lane.b32.xlu1 %v1777_v5, %s2328_s1  ;;  %p2309_p2 = scmp.lt.s32.totalorder %s2307_s19, %s2303_s18 }
 0x2a9   :  { %p2310_p3 = por %p2309_p2, %p2308_p1 }
 0x2ab   :  { %p2311_p4 = pnand %p2310_p3, %p2304_p0 }
 0x2c4   :  { %v1812_v8 = vpop.permute.xlu1 %1811  ;;  %v1814_v30 = vpop.permute.xlu0 %1813 }
 0x2c8   :  { %v1782_v22 = vpop.permute.xlu0 %1781  ;;  %v1780_v11 = vpop.permute.xlu1 %1779 }
 0x2c9   :  { %v1844_v53 = vadd.f32 %v2271_v59, %v1782_v22  ;;  %v1843_v63 = vadd.f32 %v3294_v43, %v1780_v11  ;;  %v3305_v11 = vadd.low.f32.bf16 %v3120_v9, %v3112_v46 }
 0x2cb   :  { %v1875_v41 = vadd.f32 %v1844_v53, %v1843_v63  ;;  %v3306_v53 = vadd.high.f32.bf16 %v3116_v17, %v3112_v46  ;;  %v2288_v46 = vadd.high.f32.bf16 %v1814_v30, %v2790_v38 }
 0x2cc   :  { %v1786_v55 = vpop.permute.xlu0 %1785  ;;  %v1784_v50 = vpop.permute.xlu1 %1783 }
 0x2cd   :  { %v1845_v2 = vadd.f32 %v3295_v58, %v1784_v50  ;;  %v1846_v34 = vadd.f32 %v3296_v48, %v1786_v55  ;;  %v3308_v50 = vadd.high.f32.bf16 %v3130_v1, %v3122_v42 }
 0x2cf   :  { %v1876_v21 = vadd.f32 %v1875_v41, %v1845_v2 }
 0x2d0   :  { %v1790_v14 = vpop.permute.xlu0 %1789  ;;  %v1788_v0 = vpop.permute.xlu1 %1787 }
 0x2d1   :  { %v1847_v59 = vadd.f32 %v3297_v23, %v1788_v0  ;;  %v1877_v47 = vadd.f32 %v1876_v21, %v1846_v34  ;;  %v1848_v16 = vadd.f32 %v3298_v20, %v1790_v14  ;;  %v2287_v34 = vadd.low.f32.bf16 %v1812_v8, %v2790_v38  ;;  %v3309_v23 = vld [vmem:[#allocation6_spill] sm:$0xff] }
 0x2d3   :  { %v1878_v45 = vadd.f32 %v1877_v47, %v1847_v59 }
 0x2d4   :  { %v1794_v19 = vpop.permute.xlu0 %1793  ;;  %v1792_v15 = vpop.permute.xlu1 %1791 }
 0x2d5   :  { %v1849_v3 = vadd.f32 %v3299_v54, %v1792_v15  ;;  %v1879_v37 = vadd.f32 %v1878_v45, %v1848_v16  ;;  %v1850_v40 = vadd.f32 %v3300_v31, %v1794_v19 }
 0x2d7   :  { %v1880_v36 = vadd.f32 %v1879_v37, %v1849_v3 }
 0x2d8   :  { %v1798_v27 = vpop.permute.xlu0 %1797  ;;  %v1796_v62 = vpop.permute.xlu1 %1795 }
 0x2d9   :  { %v1851_v57 = vadd.f32 %v3301_v25, %v1796_v62  ;;  %v1881_v4 = vadd.f32 %v1880_v36, %v1850_v40  ;;  %v1852_v44 = vadd.f32 %v3302_v32, %v1798_v27 }
 0x2db   :  { %v1882_v39 = vadd.f32 %v1881_v4, %v1851_v57 }
 0x2dc   :  { %v1802_v12 = vpop.permute.xlu0 %1801  ;;  %v1800_v52 = vpop.permute.xlu1 %1799 }
 0x2dd   :  { %v1853_v29 = vadd.f32 %v3303_v33, %v1800_v52  ;;  %v1883_v49 = vadd.f32 %v1882_v39, %v1852_v44  ;;  %v1854_v24 = vadd.f32 %v3304_v13, %v1802_v12 }
 0x2df   :  { %v1884_v5 = vadd.f32 %v1883_v49, %v1853_v29 }
 0x2e0   :  { %v1806_v61 = vpop.permute.xlu0 %1805  ;;  %v1804_v22 = vpop.permute.xlu1 %1803 }
 0x2e1   :  { %v1855_v28 = vadd.f32 %v3305_v11, %v1804_v22  ;;  %v1885_v26 = vadd.f32 %v1884_v5, %v1854_v24  ;;  %v1856_v43 = vadd.f32 %v3306_v53, %v1806_v61 }
 0x2e3   :  { %v1886_v63 = vadd.f32 %v1885_v26, %v1855_v28 }
 0x2e5   :  { %v1887_v56 = vadd.f32 %v1886_v63, %v1856_v43 }
 0x2f9   :  { %v1810_v41 = vpop.permute.xlu0 %1809  ;;  %v1808_v55 = vpop.permute.xlu1 %1807 }
 0x2fa   :  { %v1857_v60 = vadd.f32 %v3307_v7, %v1808_v55  ;;  %v1858_v58 = vadd.f32 %v3308_v50, %v1810_v41 }
 0x2fc   :  { %v1888_v2 = vadd.f32 %v1887_v56, %v1857_v60 }
 0x2fd   :  { %v1818_v9 = vpop.permute.xlu0 %1817  ;;  %v1816_v48 = vpop.permute.xlu1 %1815 }
 0x2fe   :  { %v1889_v21 = vadd.f32 %v1888_v2, %v1858_v58  ;;  %v2289_v59 = vadd.low.f32.bf16 %v1816_v48, %v3309_v23  ;;  %v2290_v51 = vadd.high.f32.bf16 %v1818_v9, %v3309_v23 }
 0x300   :  { %v1890_v17 = vadd.f32 %v2287_v34, %v1889_v21 }
 0x301   :  { %v1822_v14 = vpop.permute.xlu0 %1821  ;;  %v1820_v0 = vpop.permute.xlu1 %1819 }
 0x302   :  { %v1891_v47 = vadd.f32 %v2288_v46, %v1890_v17  ;;  %v2291_v1 = vadd.low.f32.bf16 %v1820_v0, %v3008_v6  ;;  %v2292_v19 = vadd.high.f32.bf16 %v1822_v14, %v3008_v6 }
 0x304   :  { %v1892_v20 = vadd.f32 %v2289_v59, %v1891_v47 }
 0x305   :  { %v1826_v16 = vpop.permute.xlu0 %1825  ;;  %v1824_v42 = vpop.permute.xlu1 %1823 }
 0x306   :  { %v1893_v45 = vadd.f32 %v2290_v51, %v1892_v20  ;;  %v2293_v38 = vadd.low.f32.bf16 %v1824_v42, %v3006_v35  ;;  %v2294_v3 = vadd.high.f32.bf16 %v1826_v16, %v3006_v35 }
 0x308   :  { %v1894_v8 = vadd.f32 %v2291_v1, %v1893_v45 }
 0x309   :  { %v1830_v15 = vpop.permute.xlu0 %1829  ;;  %v1828_v54 = vpop.permute.xlu1 %1827 }
 0x30a   :  { %v1895_v30 = vadd.f32 %v2292_v19, %v1894_v8  ;;  %v2295_v36 = vadd.low.f32.bf16 %v1828_v54, %v3014_v10  ;;  %v2296_v62 = vadd.high.f32.bf16 %v1830_v15, %v3014_v10 }
 0x30c   :  { %v1896_v37 = vadd.f32 %v2293_v38, %v1895_v30 }
 0x30d   :  { %v1834_v31 = vpop.permute.xlu0 %1833  ;;  %v1832_v40 = vpop.permute.xlu1 %1831 }
 0x30e   :  { %v1897_v27 = vadd.f32 %v2294_v3, %v1896_v37  ;;  %v2297_v6 = vadd.low.f32.bf16 %v1832_v40, %v3011_v18  ;;  %v2298_v44 = vadd.high.f32.bf16 %v1834_v31, %v3011_v18 }
 0x310   :  { %v1898_v25 = vadd.f32 %v2295_v36, %v1897_v27 }
 0x311   :  { %v1836_v57 = vpop.permute.xlu0 %1835  ;;  %v2199_v4 = vpop.permute.xlu1 %2198 }
 0x312   :  { %v1899_v32 = vadd.f32 %v2296_v62, %v1898_v25  ;;  %v2299_v33 = vadd.low.f32.bf16 %v1836_v57, %v2199_v4 }
 0x314   :  { %v1900_v39 = vadd.f32 %v2297_v6, %v1899_v32 }
 0x315   :  { %v2204_v12 = vpop.permute.xlu0 %2203  ;;  %v1838_v52 = vpop.permute.xlu1 %1837 }
 0x316   :  { %v1901_v35 = vadd.f32 %v2298_v44, %v1900_v39  ;;  %v2300_v29 = vadd.high.f32.bf16 %v1838_v52, %v2199_v4 }
 0x318   :  { %v1902_v49 = vadd.f32 %v2299_v33, %v1901_v35 }
 0x319   :  { %v1842_v13 = vpop.permute.xlu0 %1841  ;;  %v1840_v24 = vpop.permute.xlu1 %1839 }
 0x31a   :  { %v1903_v5 = vadd.f32 %v2300_v29, %v1902_v49  ;;  %v2301_v61 = vadd.low.f32.bf16 %v1840_v24, %v2204_v12  ;;  %v2302_v10 = vadd.high.f32.bf16 %v1842_v13, %v2204_v12 }
 0x31c   :  { %v1904_v22 = vadd.f32 %v2301_v61, %v1903_v5 }
 0x31e   :  { %v1905_v11 = vadd.f32 %v2302_v10, %v1904_v22 }
 0x320   :  { %v1906_v28 = vrot.slane %v1905_v11, 4 }
 0x322   :  { %v1907_v26 = vadd.f32 %v1906_v28, %v1905_v11 }
 0x324   :  { %v1908_v53 = vrot.slane %v1907_v26, 2 }
 0x326   :  { %v1909_v43 = vadd.f32 %v1908_v53, %v1907_v26 }
 0x328   :  { %v1910_v18 = vrot.slane %v1909_v43, 1 }
 0x32a   :  { %v1911_v63 = vadd.f32 %v1910_v18, %v1909_v43 }
 0x32c   :  { %1913 = vst [vmem:[#allocation2] sm:$0x1] %v1911_v63 }
 0x32d   :  { %2314 = shalt.err (!%p2311_p4)
}
 0x32e   :  { %1923 = dma.vmem_to_hbm [thread:$0]  %s1921_s17, 16, %s3257_s2, [#allocation3]  }
 0x32f   :  { %2323 = dma.done.wait [#allocation3], 16  }
 0x330   :  { %2324 = vsyncadd [#allocation3], 4294967280 }
 0x331   :  { %1927 = vsyncpa [#allocation3], 1 }

</bundles_post_ra>
